<compile_context>
chip_gen: v5e
topology: v5e:2x2
jax: 0.10.0
libtpu: 0.0.40
codegen_flags: <defaults>
</compile_context>

<pallas_src>
import jax
import jax.numpy as jnp
import numpy as np
from jax.experimental import pallas as pl
from jax.experimental.pallas import tpu as pltpu

EPS = 1e-6
NEG_SLOPE = 0.01          # default negative_slope of LeakyReLU and VNLeakyReLU
MAX_ROW_TILE = 512        # rows per grid step (big tiles amortize ~0.35us/step)


# ----------------------------------------------------------------------------
# In-kernel building blocks (everything stays 2-D: (bt, C) or (3*bt, C))
# ----------------------------------------------------------------------------
def _fused3(v0, v1, v2):
    """Stack the 3 spatial-component planes (bt, C) -> one (3*bt, C) matrix."""
    return jnp.concatenate([v0, v1, v2], axis=0)


def _planes(vf, bt):
    """Inverse of _fused3 via static, 8-aligned sublane slices."""
    return vf[:bt], vf[bt:2 * bt], vf[2 * bt:]


def _gb_linear(sca, vec_f, bt, wv1, ws1, ws2v, ws2s, wg, bg, wv2):
    """GBLinear on one row tile.

    sca:   (bt, in_sca)   scalar features
    vec_f: (3*bt, in_vec) component-fused vector features
    lin_scalar_2 is pre-split into ws2v (vnorm rows) / ws2s (z rows) so the
    reference's torch.cat becomes two matmul accumulates (no lane concat).
    """
    f32 = jnp.float32
    vi = jnp.dot(vec_f, wv1, preferred_element_type=f32)            # (3*bt, H)
    vi0, vi1, vi2 = _planes(vi, bt)
    vnorm = jnp.sqrt(vi0 * vi0 + vi1 * vi1 + vi2 * vi2)             # (bt, H)
    z = jnp.dot(sca, ws1, preferred_element_type=f32)               # (bt, SH)
    out_sca = (jnp.dot(vnorm, ws2v, preferred_element_type=f32)
               + jnp.dot(z, ws2s, preferred_element_type=f32))      # (bt, out_s)
    gate = jax.nn.sigmoid(jnp.dot(out_sca, wg, preferred_element_type=f32) + bg)
    vo = jnp.dot(vi, wv2, preferred_element_type=f32)               # (3*bt, out_v)
    vo0, vo1, vo2 = _planes(vo, bt)
    out_vec_f = _fused3(gate * vo0, gate * vo1, gate * vo2)
    return out_sca, out_vec_f


def _vn_leaky_relu(vec_f, wd, bt):
    """VNLeakyReLU on a component-fused (3*bt, C) vector tile."""
    f32 = jnp.float32
    d = jnp.dot(vec_f, wd, preferred_element_type=f32)              # (3*bt, C)
    x0, x1, x2 = _planes(vec_f, bt)
    d0, d1, d2 = _planes(d, bt)
    dot = x0 * d0 + x1 * d1 + x2 * d2                               # (bt, C)
    dsq = d0 * d0 + d1 * d1 + d2 * d2
    # Exact divide keeps numerics identical to the reference; swap to
    # dot * pl.reciprocal(dsq + EPS, approx=True) if this ever becomes
    # VALU-bound (EUP slot is otherwise idle here).
    coef = dot / (dsq + EPS)
    pos = dot >= 0
    proj = _fused3(jnp.where(pos, x0, x0 - coef * d0),
                   jnp.where(pos, x1, x1 - coef * d1),
                   jnp.where(pos, x2, x2 - coef * d2))
    return NEG_SLOPE * vec_f + (1.0 - NEG_SLOPE) * proj


# ----------------------------------------------------------------------------
# Kernel 1: node_gblinear over node-row tiles
# ----------------------------------------------------------------------------
def node_gblinear_kernel(sca_ref, vec_ref,
                         wv1, ws1, ws2v, ws2s, wg, bg, wv2,
                         osca_ref, ovec_ref):
    f32 = jnp.float32
    bt = sca_ref.shape[0]
    sca = sca_ref[...].astype(f32)
    vec_f = _fused3(vec_ref[0].astype(f32), vec_ref[1].astype(f32),
                    vec_ref[2].astype(f32))
    out_sca, out_vec_f = _gb_linear(sca, vec_f, bt,
                                    wv1[...], ws1[...], ws2v[...], ws2s[...],
                                    wg[...], bg[...], wv2[...])
    v0, v1, v2 = _planes(out_vec_f, bt)
    osca_ref[...] = out_sca.astype(osca_ref.dtype)
    ovec_ref[0] = v0.astype(ovec_ref.dtype)
    ovec_ref[1] = v1.astype(ovec_ref.dtype)
    ovec_ref[2] = v2.astype(ovec_ref.dtype)


# ----------------------------------------------------------------------------
# Kernel 2: edge_gbp -> message mixing -> out_gblinear over edge-row tiles
# ----------------------------------------------------------------------------
def message_edge_kernel(*refs):
    (nsca_ref, nvec_ref, esca_ref, evec_ref,
     e_wv1, e_ws1, e_ws2v, e_ws2s, e_wg, e_bg, e_wv2,
     wd_ref,
     wsl, bsl, we2n, be2n, wn2e, bn2e, wevn, bevn,
     o_wv1, o_ws1, o_ws2v, o_ws2s, o_wg, o_bg, o_wv2,
     osca_ref, ovec_ref) = refs

    f32 = jnp.float32
    bt = nsca_ref.shape[0]
    node_sca = nsca_ref[...].astype(f32)                            # (bt, out_s)
    nv0 = nvec_ref[0].astype(f32)                                   # (bt, out_v)
    nv1 = nvec_ref[1].astype(f32)
    nv2 = nvec_ref[2].astype(f32)
    edge_sca = esca_ref[...].astype(f32)
    edge_vec_f = _fused3(evec_ref[0].astype(f32), evec_ref[1].astype(f32),
                         evec_ref[2].astype(f32))

    # ---- edge_gbp: GBLinear -> LeakyReLU (scalar) + VNLeakyReLU (vector) ----
    e_sca, e_vec_f = _gb_linear(edge_sca, edge_vec_f, bt,
                                e_wv1[...], e_ws1[...], e_ws2v[...], e_ws2s[...],
                                e_wg[...], e_bg[...], e_wv2[...])
    e_vec_f = _vn_leaky_relu(e_vec_f, wd_ref[...], bt)
    e_sca = jnp.where(e_sca >= 0, e_sca, NEG_SLOPE * e_sca)

    # ---- message mixing ----
    y_sca = node_sca * (jnp.dot(e_sca, wsl[...], preferred_element_type=f32)
                        + bsl[...])
    g_e2n = jnp.dot(e_sca, we2n[...], preferred_element_type=f32) + be2n[...]
    g_n2e = jnp.dot(node_sca, wn2e[...], preferred_element_type=f32) + bn2e[...]
    ev = jnp.dot(e_vec_f, wevn[...], preferred_element_type=f32) + bevn[...]
    ev0, ev1, ev2 = _planes(ev, bt)
    y_vec_f = _fused3(g_e2n * nv0 + g_n2e * ev0,
                      g_e2n * nv1 + g_n2e * ev1,
                      g_e2n * nv2 + g_n2e * ev2)

    # ---- out_gblinear ----
    o_sca, o_vec_f = _gb_linear(y_sca, y_vec_f, bt,
                                o_wv1[...], o_ws1[...], o_ws2v[...], o_ws2s[...],
                                o_wg[...], o_bg[...], o_wv2[...])
    ov0, ov1, ov2 = _planes(o_vec_f, bt)
    osca_ref[...] = o_sca.astype(osca_ref.dtype)
    ovec_ref[0] = ov0.astype(ovec_ref.dtype)
    ovec_ref[1] = ov1.astype(ovec_ref.dtype)
    ovec_ref[2] = ov2.astype(ovec_ref.dtype)


# ----------------------------------------------------------------------------
# Wrappers (parameter plumbing + pallas_call)
# ----------------------------------------------------------------------------
def _gbl_kernel_weights(gp):
    """torch [out, in] GBLinear params -> the 7 (in, out) kernel operands."""
    H = gp['H']
    return [gp['wv1'].T,                 # lin_vector               (in_v, H)
            gp['ws1'].T,                 # lin_scalar_1             (in_s, SH)
            gp['ws2'][:, :H].T,          # lin_scalar_2, vnorm rows (H, out_s)
            gp['ws2'][:, H:].T,          # lin_scalar_2, z rows     (SH, out_s)
            gp['wg'].T,                  # scalar_to_vector_gates   (out_s, out_v)
            gp['bg'].reshape(1, -1),
            gp['wv2'].T]                 # lin_vector2              (H, out_v)


def _const_spec(w):
    # TODO(synk): on v7x (64 MiB VMEM), pipeline_mode=pl.Buffered(1) here would
    # stop double-buffering these grid-invariant weights if channel counts grow.
    nd = w.ndim
    return pl.BlockSpec(w.shape, lambda i, _nd=nd: (0,) * _nd)


def _pick_row_tile(n):
    bt = n if n <= MAX_ROW_TILE else MAX_ROW_TILE
    assert n % bt == 0 and bt % 8 == 0, (n, bt)
    return bt


def run_node_gblinear(node_sca, node_vec3, gbl_p, *, bt=None):
    N, in_s = node_sca.shape
    three, Nv, in_v = node_vec3.shape
    assert three == 3 and Nv == N
    out_s = gbl_p['ws2'].shape[0]
    out_v = gbl_p['wv2'].shape[0]
    bt = _pick_row_tile(N) if bt is None else bt
    weights = _gbl_kernel_weights(gbl_p)

    in_specs = ([pl.BlockSpec((bt, in_s), lambda i: (i, 0)),
                 pl.BlockSpec((3, bt, in_v), lambda i: (0, i, 0))]
                + [_const_spec(w) for w in weights])
    out_specs = [pl.BlockSpec((bt, out_s), lambda i: (i, 0)),
                 pl.BlockSpec((3, bt, out_v), lambda i: (0, i, 0))]

    fn = pl.pallas_call(
        node_gblinear_kernel,
        out_shape=(jax.ShapeDtypeStruct((N, out_s), jnp.float32),
                   jax.ShapeDtypeStruct((3, N, out_v), jnp.float32)),
        grid_spec=pltpu.PrefetchScalarGridSpec(
            num_scalar_prefetch=0, grid=(N // bt,),
            in_specs=in_specs, out_specs=out_specs),
        compiler_params=pltpu.CompilerParams(
            dimension_semantics=("parallel",)),
    )
    return fn(node_sca, node_vec3, *weights)


def run_message_edge(n_sca, n_vec3, e_sca, e_vec3, params, *, bt=None):
    E, out_s = n_sca.shape
    _, _, out_v = n_vec3.shape
    _, edge_s = e_sca.shape
    _, _, edge_v = e_vec3.shape
    bt = _pick_row_tile(E) if bt is None else bt

    weights = (_gbl_kernel_weights(params['edge_gbl'])
               + [params['wd'].T,
                  params['sca_w'].T, params['sca_b'].reshape(1, -1),
                  params['e2n_w'].T, params['e2n_b'].reshape(1, -1),
                  params['n2e_w'].T, params['n2e_b'].reshape(1, -1),
                  params['evn_w'].T, params['evn_b'].reshape(1, -1)]
               + _gbl_kernel_weights(params['out_gbl']))

    in_specs = ([pl.BlockSpec((bt, out_s), lambda i: (i, 0)),
                 pl.BlockSpec((3, bt, out_v), lambda i: (0, i, 0)),
                 pl.BlockSpec((bt, edge_s), lambda i: (i, 0)),
                 pl.BlockSpec((3, bt, edge_v), lambda i: (0, i, 0))]
                + [_const_spec(w) for w in weights])
    out_specs = [pl.BlockSpec((bt, out_s), lambda i: (i, 0)),
                 pl.BlockSpec((3, bt, out_v), lambda i: (0, i, 0))]

    fn = pl.pallas_call(
        message_edge_kernel,
        out_shape=(jax.ShapeDtypeStruct((E, out_s), jnp.float32),
                   jax.ShapeDtypeStruct((3, E, out_v), jnp.float32)),
        grid_spec=pltpu.PrefetchScalarGridSpec(
            num_scalar_prefetch=0, grid=(E // bt,),
            in_specs=in_specs, out_specs=out_specs),
        compiler_params=pltpu.CompilerParams(
            dimension_semantics=("parallel",)),
    )
    return fn(n_sca, n_vec3, e_sca, e_vec3, *weights)


def message_module_forward(node_sca, node_vec3, edge_sca, edge_vec3,
                           edge_index, params, *, bt_node=None, bt_edge=None):
    """MessageModule.forward (annealing=False) with component-major vectors."""
    n_sca, n_vec3 = run_node_gblinear(node_sca, node_vec3, params['node_gbl'],
                                      bt=bt_node)
    # node_scalar[edge_index] / node_vector[edge_index]: data-dependent row
    # gather, done in XLA between the two pallas_calls.
    # TODO(synk): could be fused into the edge kernel via a scalar-prefetch
    # DMA gather if the extra HBM round-trip ever matters.
    n_sca_e = jnp.take(n_sca, edge_index, axis=0)
    n_vec3_e = jnp.take(n_vec3, edge_index, axis=1)
    return run_message_edge(n_sca_e, n_vec3_e, edge_sca, edge_vec3, params,
                            bt=bt_edge)


# ----------------------------------------------------------------------------
# Deterministic parameter init (shapes follow the module __init__, bottleneck=1)
# ----------------------------------------------------------------------------
def _init_gbl(key, in_s, in_v, out_s, out_v):
    H = max(in_v, out_v)      # hidden_dim      (bottleneck = 1)
    SH = max(in_v, out_v)     # sca_hidden_dim  (bottleneck = 1)
    ks = jax.random.split(key, 6)
    W = lambda k, o, i: 0.2 * jax.random.normal(k, (o, i), jnp.float32)
    return dict(H=H,
                wv1=W(ks[0], H, in_v),
                ws1=W(ks[1], SH, in_s),
                ws2=W(ks[2], out_s, H + SH),
                wg=W(ks[3], out_v, out_s),
                bg=0.1 * jax.random.normal(ks[4], (out_v,), jnp.float32),
                wv2=W(ks[5], out_v, H))


def init_params(key, node_s, node_v, edge_s, edge_v, out_s, out_v):
    ks = jax.random.split(key, 9)
    kb = jax.random.split(ks[8], 4)
    W = lambda k, o, i: 0.2 * jax.random.normal(k, (o, i), jnp.float32)
    b = lambda k, o: 0.1 * jax.random.normal(k, (o,), jnp.float32)
    return dict(
        node_gbl=_init_gbl(ks[0], node_s, node_v, out_s, out_v),
        edge_gbl=_init_gbl(ks[1], edge_s, edge_v, edge_s, edge_v),  # hid == edge
        out_gbl=_init_gbl(ks[2], out_s, out_v, out_s, out_v),
        wd=W(ks[3], edge_v, edge_v),                 # VNLeakyReLU.map_to_dir
        sca_w=W(ks[4], out_s, edge_s), sca_b=b(kb[0], out_s),
        e2n_w=W(ks[5], out_v, edge_s), e2n_b=b(kb[1], out_v),
        n2e_w=W(ks[6], out_v, out_s), n2e_b=b(kb[2], out_v),
        evn_w=W(ks[7], out_v, edge_v), evn_b=b(kb[3], out_v),
    )


# ----------------------------------------------------------------------------
# Pure-JAX reference in the original PyTorch layout (B, C, 3)
# ----------------------------------------------------------------------------
def reference_forward(node_sca, node_vec, edge_sca, edge_vec, edge_index, p):
    def vnlin(x, W, bias=None):                     # x: [B, C, 3], W: [out, in]
        y = jnp.einsum('oc,bck->bok', W, x)
        if bias is not None:
            y = y + bias[None, :, None]
        return y

    def gbl(gp, sca, vec):
        vi = vnlin(vec, gp['wv1'])
        vnorm = jnp.linalg.norm(vi, axis=-1)
        z = sca @ gp['ws1'].T
        cat = jnp.concatenate([vnorm, z], axis=-1)
        osca = cat @ gp['ws2'].T
        gate = jax.nn.sigmoid(osca @ gp['wg'].T + gp['bg'])[..., None]
        return osca, gate * vnlin(vi, gp['wv2'])

    nsca, nvec = gbl(p['node_gbl'], node_sca, node_vec)
    nsca = nsca[edge_index]
    nvec = nvec[edge_index]

    esca, evec = gbl(p['edge_gbl'], edge_sca, edge_vec)
    d = vnlin(evec, p['wd'])
    dot = jnp.sum(evec * d, axis=-1, keepdims=True)
    mask = (dot >= 0).astype(jnp.float32)
    dsq = jnp.sum(d * d, axis=-1, keepdims=True)
    evec = NEG_SLOPE * evec + (1.0 - NEG_SLOPE) * (
        mask * evec + (1.0 - mask) * (evec - dot / (dsq + EPS) * d))
    esca = jnp.where(esca >= 0, esca, NEG_SLOPE * esca)

    y_sca = nsca * (esca @ p['sca_w'].T + p['sca_b'])
    y_nvec = (esca @ p['e2n_w'].T + p['e2n_b'])[..., None] * nvec
    y_evec = (nsca @ p['n2e_w'].T + p['n2e_b'])[..., None] * vnlin(
        evec, p['evn_w'], p['evn_b'])
    y_vec = y_nvec + y_evec

    return gbl(p['out_gbl'], y_sca, y_vec)


if __name__ == "__main__":
    node_s, node_v = 16, 8
    edge_s, edge_v = 16, 8
    out_s, out_v = 16, 8
    N, E = 128, 1024       # node grid = 1 step of 128 rows; edge grid = 2 x 512

    key = jax.random.PRNGKey(0)
    kp, k1, k2, k3, k4, k5 = jax.random.split(key, 6)
    params = init_params(kp, node_s, node_v, edge_s, edge_v, out_s, out_v)

    node_sca = jax.random.normal(k1, (N, node_s), jnp.float32)
    node_vec = jax.random.normal(k2, (N, node_v, 3), jnp.float32)   # torch layout
    edge_sca = jax.random.normal(k3, (E, edge_s), jnp.float32)
    edge_vec = jax.random.normal(k4, (E, edge_v, 3), jnp.float32)
    edge_index = jax.random.randint(k5, (E,), 0, N, jnp.int32)

    node_vec3 = jnp.transpose(node_vec, (2, 0, 1))   # kernel layout (3, N, C)
    edge_vec3 = jnp.transpose(edge_vec, (2, 0, 1))

    out_sca, out_vec3 = message_module_forward(
        node_sca, node_vec3, edge_sca, edge_vec3, edge_index, params)
    out_sca, out_vec3 = jax.block_until_ready((out_sca, out_vec3))

    ref_sca, ref_vec = reference_forward(node_sca, node_vec, edge_sca, edge_vec,
                                         edge_index, params)
    np.testing.assert_allclose(np.asarray(out_sca), np.asarray(ref_sca),
                               rtol=2e-3, atol=2e-3)
    np.testing.assert_allclose(
        np.asarray(jnp.transpose(out_vec3, (1, 2, 0))), np.asarray(ref_vec),
        rtol=2e-3, atol=2e-3)
    print("KERNEL_OK")
</pallas_src>

<mosaic_0001>
module attributes {stable_mosaic.version = 11 : i64} {
  func.func @node_gblinear_kernel(%arg0: i32, %arg1: memref<128x16xf32, #tpu.memory_space<vmem>>, %arg2: memref<3x128x8xf32, #tpu.memory_space<vmem>>, %arg3: memref<8x8xf32, #tpu.memory_space<vmem>>, %arg4: memref<16x8xf32, #tpu.memory_space<vmem>>, %arg5: memref<8x16xf32, #tpu.memory_space<vmem>>, %arg6: memref<8x16xf32, #tpu.memory_space<vmem>>, %arg7: memref<16x8xf32, #tpu.memory_space<vmem>>, %arg8: memref<1x8xf32, #tpu.memory_space<vmem>>, %arg9: memref<8x8xf32, #tpu.memory_space<vmem>>, %arg10: memref<128x16xf32, #tpu.memory_space<vmem>>, %arg11: memref<3x128x8xf32, #tpu.memory_space<vmem>>) attributes {dimension_semantics = [#tpu.dimension_semantics<parallel>], iteration_bounds = array<i64: 1>, scalar_prefetch = 0 : i64, scratch_operands = 0 : i64, tpu.core_type = #tpu.core_type<tc>, window_params = [{transform_indices = @transform_0, window_bounds = array<i64: 128, 16>}, {transform_indices = @transform_1, window_bounds = array<i64: 3, 128, 8>}, {pipeline_mode = #tpu.pipeline_mode<synchronous>, transform_indices = @transform_2, window_bounds = array<i64: 8, 8>}, {pipeline_mode = #tpu.pipeline_mode<synchronous>, transform_indices = @transform_3, window_bounds = array<i64: 16, 8>}, {pipeline_mode = #tpu.pipeline_mode<synchronous>, transform_indices = @transform_4, window_bounds = array<i64: 8, 16>}, {pipeline_mode = #tpu.pipeline_mode<synchronous>, transform_indices = @transform_5, window_bounds = array<i64: 8, 16>}, {pipeline_mode = #tpu.pipeline_mode<synchronous>, transform_indices = @transform_6, window_bounds = array<i64: 16, 8>}, {pipeline_mode = #tpu.pipeline_mode<synchronous>, transform_indices = @transform_7, window_bounds = array<i64: 1, 8>}, {pipeline_mode = #tpu.pipeline_mode<synchronous>, transform_indices = @transform_8, window_bounds = array<i64: 8, 8>}, {transform_indices = @transform_9, window_bounds = array<i64: 128, 16>}, {transform_indices = @transform_10, window_bounds = array<i64: 3, 128, 8>}]} {
    %c0 = arith.constant 0 : index
    %c0_0 = arith.constant 0 : index
    %0 = vector.load %arg1[%c0, %c0_0] : memref<128x16xf32, #tpu.memory_space<vmem>>, vector<128x16xf32>
    %c0_1 = arith.constant 0 : index
    %c0_2 = arith.constant 0 : index
    %c0_3 = arith.constant 0 : index
    %1 = vector.load %arg2[%c0_1, %c0_2, %c0_3] : memref<3x128x8xf32, #tpu.memory_space<vmem>>, vector<1x128x8xf32>
    %2 = vector.shape_cast %1 : vector<1x128x8xf32> to vector<128x8xf32>
    %c1 = arith.constant 1 : index
    %c0_4 = arith.constant 0 : index
    %c0_5 = arith.constant 0 : index
    %3 = vector.load %arg2[%c1, %c0_4, %c0_5] : memref<3x128x8xf32, #tpu.memory_space<vmem>>, vector<1x128x8xf32>
    %4 = vector.shape_cast %3 : vector<1x128x8xf32> to vector<128x8xf32>
    %c2 = arith.constant 2 : index
    %c0_6 = arith.constant 0 : index
    %c0_7 = arith.constant 0 : index
    %5 = vector.load %arg2[%c2, %c0_6, %c0_7] : memref<3x128x8xf32, #tpu.memory_space<vmem>>, vector<1x128x8xf32>
    %6 = vector.shape_cast %5 : vector<1x128x8xf32> to vector<128x8xf32>
    %7 = tpu.concatenate %2, %4, %6 in 0 : vector<128x8xf32>, vector<128x8xf32>, vector<128x8xf32> -> vector<384x8xf32>
    %c0_8 = arith.constant 0 : index
    %c0_9 = arith.constant 0 : index
    %8 = vector.load %arg3[%c0_8, %c0_9] : memref<8x8xf32, #tpu.memory_space<vmem>>, vector<8x8xf32>
    %c0_10 = arith.constant 0 : index
    %c0_11 = arith.constant 0 : index
    %9 = vector.load %arg4[%c0_10, %c0_11] : memref<16x8xf32, #tpu.memory_space<vmem>>, vector<16x8xf32>
    %c0_12 = arith.constant 0 : index
    %c0_13 = arith.constant 0 : index
    %10 = vector.load %arg5[%c0_12, %c0_13] : memref<8x16xf32, #tpu.memory_space<vmem>>, vector<8x16xf32>
    %c0_14 = arith.constant 0 : index
    %c0_15 = arith.constant 0 : index
    %11 = vector.load %arg6[%c0_14, %c0_15] : memref<8x16xf32, #tpu.memory_space<vmem>>, vector<8x16xf32>
    %c0_16 = arith.constant 0 : index
    %c0_17 = arith.constant 0 : index
    %12 = vector.load %arg7[%c0_16, %c0_17] : memref<16x8xf32, #tpu.memory_space<vmem>>, vector<16x8xf32>
    %c0_18 = arith.constant 0 : index
    %c0_19 = arith.constant 0 : index
    %13 = vector.load %arg8[%c0_18, %c0_19] : memref<1x8xf32, #tpu.memory_space<vmem>>, vector<1x8xf32>
    %c0_20 = arith.constant 0 : index
    %c0_21 = arith.constant 0 : index
    %14 = vector.load %arg9[%c0_20, %c0_21] : memref<8x8xf32, #tpu.memory_space<vmem>>, vector<8x8xf32>
    %cst = arith.constant dense<0.000000e+00> : vector<384x8xf32>
    %15 = tpu.matmul %7, %8, %cst {dimension_numbers = #tpu.dot_dimension_numbers<[1], [0], [0], [1], [0, 0, 1, 1], [], []>} : vector<384x8xf32>, vector<8x8xf32>, vector<384x8xf32> -> vector<384x8xf32>
    %16 = vector.extract_strided_slice %15 {offsets = [0, 0], sizes = [128, 8], strides = [1, 1]} : vector<384x8xf32> to vector<128x8xf32>
    %17 = vector.extract_strided_slice %15 {offsets = [128, 0], sizes = [128, 8], strides = [1, 1]} : vector<384x8xf32> to vector<128x8xf32>
    %18 = vector.extract_strided_slice %15 {offsets = [256, 0], sizes = [128, 8], strides = [1, 1]} : vector<384x8xf32> to vector<128x8xf32>
    %19 = arith.mulf %16, %16 : vector<128x8xf32>
    %20 = arith.mulf %17, %17 : vector<128x8xf32>
    %21 = arith.addf %19, %20 : vector<128x8xf32>
    %22 = arith.mulf %18, %18 : vector<128x8xf32>
    %23 = arith.addf %21, %22 : vector<128x8xf32>
    %24 = math.sqrt %23 : vector<128x8xf32>
    %cst_22 = arith.constant dense<0.000000e+00> : vector<128x8xf32>
    %25 = tpu.matmul %0, %9, %cst_22 {dimension_numbers = #tpu.dot_dimension_numbers<[1], [0], [0], [1], [0, 0, 1, 1], [], []>} : vector<128x16xf32>, vector<16x8xf32>, vector<128x8xf32> -> vector<128x8xf32>
    %cst_23 = arith.constant dense<0.000000e+00> : vector<128x16xf32>
    %26 = tpu.matmul %24, %10, %cst_23 {dimension_numbers = #tpu.dot_dimension_numbers<[1], [0], [0], [1], [0, 0, 1, 1], [], []>} : vector<128x8xf32>, vector<8x16xf32>, vector<128x16xf32> -> vector<128x16xf32>
    %cst_24 = arith.constant dense<0.000000e+00> : vector<128x16xf32>
    %27 = tpu.matmul %25, %11, %cst_24 {dimension_numbers = #tpu.dot_dimension_numbers<[1], [0], [0], [1], [0, 0, 1, 1], [], []>} : vector<128x8xf32>, vector<8x16xf32>, vector<128x16xf32> -> vector<128x16xf32>
    %28 = arith.addf %26, %27 : vector<128x16xf32>
    %cst_25 = arith.constant dense<0.000000e+00> : vector<128x8xf32>
    %29 = tpu.matmul %28, %12, %cst_25 {dimension_numbers = #tpu.dot_dimension_numbers<[1], [0], [0], [1], [0, 0, 1, 1], [], []>} : vector<128x16xf32>, vector<16x8xf32>, vector<128x8xf32> -> vector<128x8xf32>
    %30 = vector.broadcast %13 : vector<1x8xf32> to vector<128x8xf32>
    %31 = arith.addf %29, %30 : vector<128x8xf32>
    %32 = arith.negf %31 : vector<128x8xf32>
    %33 = math.exp %32 : vector<128x8xf32>
    %cst_26 = arith.constant 1.000000e+00 : f32
    %34 = vector.broadcast %cst_26 : f32 to vector<128x8xf32>
    %35 = arith.addf %34, %33 : vector<128x8xf32>
    %36 = arith.divf %34, %35 : vector<128x8xf32>
    %cst_27 = arith.constant dense<0.000000e+00> : vector<384x8xf32>
    %37 = tpu.matmul %15, %14, %cst_27 {dimension_numbers = #tpu.dot_dimension_numbers<[1], [0], [0], [1], [0, 0, 1, 1], [], []>} : vector<384x8xf32>, vector<8x8xf32>, vector<384x8xf32> -> vector<384x8xf32>
    %38 = vector.extract_strided_slice %37 {offsets = [0, 0], sizes = [128, 8], strides = [1, 1]} : vector<384x8xf32> to vector<128x8xf32>
    %39 = vector.extract_strided_slice %37 {offsets = [128, 0], sizes = [128, 8], strides = [1, 1]} : vector<384x8xf32> to vector<128x8xf32>
    %40 = vector.extract_strided_slice %37 {offsets = [256, 0], sizes = [128, 8], strides = [1, 1]} : vector<384x8xf32> to vector<128x8xf32>
    %41 = arith.mulf %36, %38 : vector<128x8xf32>
    %42 = arith.mulf %36, %39 : vector<128x8xf32>
    %43 = arith.mulf %36, %40 : vector<128x8xf32>
    %44 = tpu.concatenate %41, %42, %43 in 0 : vector<128x8xf32>, vector<128x8xf32>, vector<128x8xf32> -> vector<384x8xf32>
    %45 = vector.extract_strided_slice %44 {offsets = [0, 0], sizes = [128, 8], strides = [1, 1]} : vector<384x8xf32> to vector<128x8xf32>
    %46 = vector.extract_strided_slice %44 {offsets = [128, 0], sizes = [128, 8], strides = [1, 1]} : vector<384x8xf32> to vector<128x8xf32>
    %47 = vector.extract_strided_slice %44 {offsets = [256, 0], sizes = [128, 8], strides = [1, 1]} : vector<384x8xf32> to vector<128x8xf32>
    %c0_28 = arith.constant 0 : index
    %c0_29 = arith.constant 0 : index
    %48 = vector.load %arg10[%c0_28, %c0_29] : memref<128x16xf32, #tpu.memory_space<vmem>>, vector<128x16xf32>
    tpu.vector_store %arg10[%c0_28, %c0_29], %28 {strides = array<i32>} : memref<128x16xf32, #tpu.memory_space<vmem>>, vector<128x16xf32>,
    %c0_30 = arith.constant 0 : index
    %c0_31 = arith.constant 0 : index
    %c0_32 = arith.constant 0 : index
    %49 = vector.load %arg11[%c0_30, %c0_31, %c0_32] : memref<3x128x8xf32, #tpu.memory_space<vmem>>, vector<1x128x8xf32>
    %50 = vector.shape_cast %49 : vector<1x128x8xf32> to vector<128x8xf32>
    %51 = vector.shape_cast %45 : vector<128x8xf32> to vector<1x128x8xf32>
    tpu.vector_store %arg11[%c0_30, %c0_31, %c0_32], %51 {strides = array<i32>} : memref<3x128x8xf32, #tpu.memory_space<vmem>>, vector<1x128x8xf32>,
    %c1_33 = arith.constant 1 : index
    %c0_34 = arith.constant 0 : index
    %c0_35 = arith.constant 0 : index
    %52 = vector.load %arg11[%c1_33, %c0_34, %c0_35] : memref<3x128x8xf32, #tpu.memory_space<vmem>>, vector<1x128x8xf32>
    %53 = vector.shape_cast %52 : vector<1x128x8xf32> to vector<128x8xf32>
    %54 = vector.shape_cast %46 : vector<128x8xf32> to vector<1x128x8xf32>
    tpu.vector_store %arg11[%c1_33, %c0_34, %c0_35], %54 {strides = array<i32>} : memref<3x128x8xf32, #tpu.memory_space<vmem>>, vector<1x128x8xf32>,
    %c2_36 = arith.constant 2 : index
    %c0_37 = arith.constant 0 : index
    %c0_38 = arith.constant 0 : index
    %55 = vector.load %arg11[%c2_36, %c0_37, %c0_38] : memref<3x128x8xf32, #tpu.memory_space<vmem>>, vector<1x128x8xf32>
    %56 = vector.shape_cast %55 : vector<1x128x8xf32> to vector<128x8xf32>
    %57 = vector.shape_cast %47 : vector<128x8xf32> to vector<1x128x8xf32>
    tpu.vector_store %arg11[%c2_36, %c0_37, %c0_38], %57 {strides = array<i32>} : memref<3x128x8xf32, #tpu.memory_space<vmem>>, vector<1x128x8xf32>,
    return
  }
  func.func @transform_0(%arg0: i32) -> (i32, i32) {
    %c0_i32 = arith.constant 0 : i32
    %c0_i32_0 = arith.constant 0 : i32
    return %arg0, %c0_i32 : i32, i32
  }
  func.func @transform_1(%arg0: i32) -> (i32, i32, i32) {
    %c0_i32 = arith.constant 0 : i32
    %c0_i32_0 = arith.constant 0 : i32
    %c0_i32_1 = arith.constant 0 : i32
    return %c0_i32, %arg0, %c0_i32_0 : i32, i32, i32
  }
  func.func @transform_2(%arg0: i32) -> (i32, i32) {
    %c0_i32 = arith.constant 0 : i32
    %c0_i32_0 = arith.constant 0 : i32
    %c0_i32_1 = arith.constant 0 : i32
    return %c0_i32, %c0_i32_0 : i32, i32
  }
  func.func @transform_3(%arg0: i32) -> (i32, i32) {
    %c0_i32 = arith.constant 0 : i32
    %c0_i32_0 = arith.constant 0 : i32
    %c0_i32_1 = arith.constant 0 : i32
    return %c0_i32, %c0_i32_0 : i32, i32
  }
  func.func @transform_4(%arg0: i32) -> (i32, i32) {
    %c0_i32 = arith.constant 0 : i32
    %c0_i32_0 = arith.constant 0 : i32
    %c0_i32_1 = arith.constant 0 : i32
    return %c0_i32, %c0_i32_0 : i32, i32
  }
  func.func @transform_5(%arg0: i32) -> (i32, i32) {
    %c0_i32 = arith.constant 0 : i32
    %c0_i32_0 = arith.constant 0 : i32
    %c0_i32_1 = arith.constant 0 : i32
    return %c0_i32, %c0_i32_0 : i32, i32
  }
  func.func @transform_6(%arg0: i32) -> (i32, i32) {
    %c0_i32 = arith.constant 0 : i32
    %c0_i32_0 = arith.constant 0 : i32
    %c0_i32_1 = arith.constant 0 : i32
    return %c0_i32, %c0_i32_0 : i32, i32
  }
  func.func @transform_7(%arg0: i32) -> (i32, i32) {
    %c0_i32 = arith.constant 0 : i32
    %c0_i32_0 = arith.constant 0 : i32
    %c0_i32_1 = arith.constant 0 : i32
    return %c0_i32, %c0_i32_0 : i32, i32
  }
  func.func @transform_8(%arg0: i32) -> (i32, i32) {
    %c0_i32 = arith.constant 0 : i32
    %c0_i32_0 = arith.constant 0 : i32
    %c0_i32_1 = arith.constant 0 : i32
    return %c0_i32, %c0_i32_0 : i32, i32
  }
  func.func @transform_9(%arg0: i32) -> (i32, i32) {
    %c0_i32 = arith.constant 0 : i32
    %c0_i32_0 = arith.constant 0 : i32
    return %arg0, %c0_i32 : i32, i32
  }
  func.func @transform_10(%arg0: i32) -> (i32, i32, i32) {
    %c0_i32 = arith.constant 0 : i32
    %c0_i32_0 = arith.constant 0 : i32
    %c0_i32_1 = arith.constant 0 : i32
    return %c0_i32, %arg0, %c0_i32_0 : i32, i32, i32
  }
}

</mosaic_0001>

<bundles_post_ra>
// kernel: tpu_custom_call.1
= control target key start
LH: loop header
LB: loop body
LE: loop exit
PB: predicated region body
PF: predicated region fallthrough
CT: control target
= control target key end

     0   :  { %vm109_vm0 = vcmask 64512   ;;  %vm687_vm1 = vcmask 130048   ;;  %s3520_s2 = inlined_call_operand.vmem [shape: f32[8,8], index: 2, kind: input, shape index: {}]   ;;  %s3521_s3 = inlined_call_operand.vmem [shape: f32[16,8], index: 3, kind: input, shape index: {}]   ;;  %s3522_s1 = inlined_call_operand.vmem [shape: f32[3,128,8], index: 1, kind: input, shape index: {}]   ;;  %s3523_s0 = inlined_call_operand.vmem [shape: f32[128,16], index: 0, kind: input, shape index: {}]   ;;  %s3524_s8 = inlined_call_operand.vmem [shape: f32[8,8], index: 8, kind: input, shape index: {}]   ;;  %s3525_s5 = inlined_call_operand.vmem [shape: f32[8,16], index: 5, kind: input, shape index: {}]   ;;  %s3526_s4 = inlined_call_operand.vmem [shape: f32[8,16], index: 4, kind: input, shape index: {}]   ;;  %s3527_s6 = inlined_call_operand.vmem [shape: f32[16,8], index: 6, kind: input, shape index: {}]   ;;  %s3528_s9 = inlined_call_operand.vmem [shape: f32[128,16], index: 9, kind: output, shape index: {0}]   ;;  %s3529_s7 = inlined_call_operand.vmem [shape: f32[1,8], index: 7, kind: input, shape index: {}]   ;;  %s3530_s10 = inlined_call_operand.vmem [shape: f32[3,128,8], index: 10, kind: output, shape index: {1}]  }
   0x1   :  { %v100_v0 = vld [vmem:[%s3520_s2] sm:$0xff]  ;;  %v102_v1 = vld [vmem:[%s3521_s3 + $0x8] sm:$0xff]  ;;  %v52_v7 = vld [vmem:[%s3522_s1 + $0x10] sm:$0xff] }
   0x2   :  { %v50_v2 = vld [vmem:[%s3522_s1] sm:$0xff]  ;;  %269 = vmatpush.msra.mxu0 %v100_v0  ;;  %750 = vmatpush.msra.mxu1 %v102_v1  ;;  %v51_v5 = vld [vmem:[%s3522_s1 + $0x8] sm:$0xff]  ;;  %v36_v8 = vld [vmem:[%s3523_s0 + $0x10] sm:$0xff] }
   0x3   :  { %v101_v3 = vld [vmem:[%s3521_s3] sm:$0xff]  ;;  %1906 = vmatmul.msk.f32.vlgmr.msra.gmra.mxu0 %vm109_vm0, %v50_v2  ;;  %2114 = vmatpush.msra.mxu2 %v100_v0  ;;  %v35_v6 = vld [vmem:[%s3523_s0 + $0x8] sm:$0xff]  ;;  %v53_v9 = vld [vmem:[%s3522_s1 + $0x18] sm:$0xff] }
   0x4   :  { %v34_v4 = vld [vmem:[%s3523_s0] sm:$0xff]  ;;  %751 = vmatpush.msra.mxu1 %v101_v3  ;;  %v37_v10 = vld [vmem:[%s3523_s0 + $0x18] sm:$0xff]  ;;  %v55_v13 = vld [vmem:[%s3522_s1 + $0x28] sm:$0xff] }
   0x5   :  { %1954 = vmatmul.msk.f32.vlgmr.msra.gmra.mxu1 %vm687_vm1, %v34_v4  ;;  %v54_v11 = vld [vmem:[%s3522_s1 + $0x20] sm:$0xff]  ;;  %v39_v14 = vld [vmem:[%s3523_s0 + $0x28] sm:$0xff]  ;;  %v56_v15 = vld [vmem:[%s3522_s1 + $0x30] sm:$0xff] }
   0x6   :  { %v38_v12 = vld [vmem:[%s3523_s0 + $0x20] sm:$0xff]  ;;  %v40_v16 = vld [vmem:[%s3523_s0 + $0x30] sm:$0xff]  ;;  %v57_v17 = vld [vmem:[%s3522_s1 + $0x38] sm:$0xff] }
   0x7   :  { %v41_v18 = vld [vmem:[%s3523_s0 + $0x38] sm:$0xff]  ;;  %v58_v19 = vld [vmem:[%s3522_s1 + $0x40] sm:$0xff]  ;;  %v59_v21 = vld [vmem:[%s3522_s1 + $0x48] sm:$0xff] }
   0x8   :  { %v42_v20 = vld [vmem:[%s3523_s0 + $0x40] sm:$0xff]  ;;  %v43_v22 = vld [vmem:[%s3523_s0 + $0x48] sm:$0xff]  ;;  %v60_v23 = vld [vmem:[%s3522_s1 + $0x50] sm:$0xff] }
   0x9   :  { %v44_v24 = vld [vmem:[%s3523_s0 + $0x50] sm:$0xff]  ;;  %v61_v25 = vld [vmem:[%s3522_s1 + $0x58] sm:$0xff]  ;;  %v62_v27 = vld [vmem:[%s3522_s1 + $0x60] sm:$0xff] }
   0xa   :  { %v45_v26 = vld [vmem:[%s3523_s0 + $0x58] sm:$0xff]  ;;  %v46_v28 = vld [vmem:[%s3523_s0 + $0x60] sm:$0xff]  ;;  %v63_v30 = vld [vmem:[%s3522_s1 + $0x68] sm:$0xff] }
   0xb   :  { %1907 = vmatmul.msk.f32.gmra.mxu0 %vm109_vm0, %v51_v5  ;;  %v2383_v29 = vld [vmem:[%s3524_s8] sm:$0xff]  ;;  %v47_v31 = vld [vmem:[%s3523_s0 + $0x68] sm:$0xff]  ;;  %v64_v32 = vld [vmem:[%s3522_s1 + $0x70] sm:$0xff] }
   0xc   :  { %1606 = vmatpush.msrb.mxu1 %v2383_v29  ;;  %v48_v33 = vld [vmem:[%s3523_s0 + $0x70] sm:$0xff]  ;;  %v65_v34 = vld [vmem:[%s3522_s1 + $0x78] sm:$0xff]  ;;  %v1874_v37 = vld [vmem:[%s3522_s1 + $0x80] sm:$0xff] }
   0xd   :  { %1955 = vmatmul.msk.f32.gmra.mxu1 %vm687_vm1, %v35_v6  ;;  %v49_v35 = vld [vmem:[%s3523_s0 + $0x78] sm:$0xff]  ;;  %v1875_v39 = vld [vmem:[%s3522_s1 + $0x88] sm:$0xff]  ;;  %v1876_v41 = vld [vmem:[%s3522_s1 + $0x90] sm:$0xff] }
   0xe   :  { %v1877_v43 = vld [vmem:[%s3522_s1 + $0x98] sm:$0xff]  ;;  %v1898_v44 = vld [vmem:[%s3522_s1 + $0x140] sm:$0xff]  ;;  %v1899_v47 = vld [vmem:[%s3522_s1 + $0x148] sm:$0xff] }
   0xf   :  { %1946 = vmatmul.msk.f32.vlgmr.msra.gmra.mxu2 %vm109_vm0, %v1898_v44  ;;  %v1878_v46 = vld [vmem:[%s3522_s1 + $0xa0] sm:$0xff]  ;;  %v1879_v50 = vld [vmem:[%s3522_s1 + $0xa8] sm:$0xff]  ;;  %v1900_v51 = vld [vmem:[%s3522_s1 + $0x150] sm:$0xff] }
  0x10   :  { %v1880_v53 = vld [vmem:[%s3522_s1 + $0xb0] sm:$0xff]  ;;  %v1901_v55 = vld [vmem:[%s3522_s1 + $0x158] sm:$0xff]  ;;  %v1902_v59 = vld [vmem:[%s3522_s1 + $0x160] sm:$0xff] }
  0x11   :  { %v1881_v57 = vld [vmem:[%s3522_s1 + $0xb8] sm:$0xff]  ;;  %v1882_v61 = vld [vmem:[%s3522_s1 + $0xc0] sm:$0xff]  ;;  %v1903_v63 = vld [vmem:[%s3522_s1 + $0x168] sm:$0xff] }
  0x12   :  { %v1883_v1 = vld [vmem:[%s3522_s1 + $0xc8] sm:$0xff]  ;;  %v1904_v2 = vld [vmem:[%s3522_s1 + $0x170] sm:$0xff]  ;;  %v1905_v6 = vld [vmem:[%s3522_s1 + $0x178] sm:$0xff] }
  0x13   :  { %1908 = vmatmul.msk.f32.gmra.mxu0 %vm109_vm0, %v52_v7  ;;  %v1884_v5 = vld [vmem:[%s3522_s1 + $0xd0] sm:$0xff] }
  0x14   :  { %v1896_v44 = vld [vmem:[%s3522_s1 + $0x130] sm:$0xff] }
  0x15   :  { %1956 = vmatmul.msk.f32.gmra.mxu1 %vm687_vm1, %v36_v8  ;;  %v1885_v8 = vld [vmem:[%s3522_s1 + $0xd8] sm:$0xff] }
  0x17   :  { %1947 = vmatmul.msk.f32.gmra.mxu2 %vm109_vm0, %v1899_v47 }
  0x1b   :  { %1909 = vmatmul.msk.f32.gmra.mxu0 %vm109_vm0, %v53_v9 }
  0x1d   :  { %1957 = vmatmul.msk.f32.gmra.mxu1 %vm687_vm1, %v37_v10 }
  0x1f   :  { %1948 = vmatmul.msk.f32.gmra.mxu2 %vm109_vm0, %v1900_v51 }
  0x23   :  { %1910 = vmatmul.msk.f32.gmra.mxu0 %vm109_vm0, %v54_v11  ;;  %v1886_v11 = vld [vmem:[%s3522_s1 + $0xe0] sm:$0xff] }
  0x25   :  { %1958 = vmatmul.msk.f32.gmra.mxu1 %vm687_vm1, %v38_v12 }
  0x27   :  { %1949 = vmatmul.msk.f32.gmra.mxu2 %vm109_vm0, %v1901_v55 }
  0x2b   :  { %1911 = vmatmul.msk.f32.gmra.mxu0 %vm109_vm0, %v55_v13 }
  0x2d   :  { %1959 = vmatmul.msk.f32.gmra.mxu1 %vm687_vm1, %v39_v14  ;;  %v1887_v14 = vld [vmem:[%s3522_s1 + $0xe8] sm:$0xff] }
  0x2f   :  { %1950 = vmatmul.msk.f32.gmra.mxu2 %vm109_vm0, %v1902_v59  ;;  %v104_v59 = vld [vmem:[%s3525_s5] sm:$0xff] }
  0x30   :  { %864 = vmatpush.msrb.mxu2 %v104_v59 }
  0x33   :  { %1912 = vmatmul.msk.f32.gmra.mxu0 %vm109_vm0, %v56_v15 }
  0x35   :  { %1960 = vmatmul.msk.f32.gmra.mxu1 %vm687_vm1, %v40_v16 }
  0x37   :  { %1951 = vmatmul.msk.f32.gmra.mxu2 %vm109_vm0, %v1903_v63 }
  0x3b   :  { %1913 = vmatmul.msk.f32.gmra.mxu0 %vm109_vm0, %v57_v17  ;;  %v1888_v17 = vld [vmem:[%s3522_s1 + $0xf0] sm:$0xff] }
  0x3d   :  { %1961 = vmatmul.msk.f32.gmra.mxu1 %vm687_vm1, %v41_v18 }
  0x3f   :  { %1952 = vmatmul.msk.f32.gmra.mxu2 %vm109_vm0, %v1904_v2 }
  0x43   :  { %1914 = vmatmul.msk.f32.gmra.mxu0 %vm109_vm0, %v58_v19 }
  0x45   :  { %1962 = vmatmul.msk.f32.gmra.mxu1 %vm687_vm1, %v42_v20  ;;  %v1889_v20 = vld [vmem:[%s3522_s1 + $0xf8] sm:$0xff] }
  0x47   :  { %1953 = vmatmul.msk.f32.gmra.mxu2 %vm109_vm0, %v1905_v6 }
  0x4b   :  { %1915 = vmatmul.msk.f32.gmra.mxu0 %vm109_vm0, %v59_v21 }
  0x4d   :  { %1963 = vmatmul.msk.f32.gmra.mxu1 %vm687_vm1, %v43_v22  ;;  %v1890_v22 = vld [vmem:[%s3522_s1 + $0x100] sm:$0xff] }
  0x53   :  { %1916 = vmatmul.msk.f32.gmra.mxu0 %vm109_vm0, %v60_v23 }
  0x55   :  { %1964 = vmatmul.msk.f32.gmra.mxu1 %vm687_vm1, %v44_v24 }
  0x5b   :  { %1917 = vmatmul.msk.f32.gmra.mxu0 %vm109_vm0, %v61_v25  ;;  %v1891_v25 = vld [vmem:[%s3522_s1 + $0x108] sm:$0xff] }
  0x5d   :  { %1965 = vmatmul.msk.f32.gmra.mxu1 %vm687_vm1, %v45_v26 }
  0x63   :  { %1918 = vmatmul.msk.f32.gmra.mxu0 %vm109_vm0, %v62_v27 }
  0x65   :  { %1966 = vmatmul.msk.f32.gmra.mxu1 %vm687_vm1, %v46_v28  ;;  %v1892_v28 = vld [vmem:[%s3522_s1 + $0x110] sm:$0xff] }
  0x6b   :  { %1919 = vmatmul.msk.f32.gmra.mxu0 %vm109_vm0, %v63_v30 }
  0x6d   :  { %1967 = vmatmul.msk.f32.gmra.mxu1 %vm687_vm1, %v47_v31 }
  0x73   :  { %1920 = vmatmul.msk.f32.gmra.mxu0 %vm109_vm0, %v64_v32  ;;  %v1893_v32 = vld [vmem:[%s3522_s1 + $0x118] sm:$0xff] }
  0x75   :  { %1968 = vmatmul.msk.f32.gmra.mxu1 %vm687_vm1, %v48_v33 }
  0x7b   :  { %1921 = vmatmul.msk.f32.gmra.mxu0 %vm109_vm0, %v65_v34 }
  0x7d   :  { %1969 = vmatmul.msk.f32.gmra.mxu1 %vm687_vm1, %v49_v35  ;;  %v1894_v35 = vld [vmem:[%s3522_s1 + $0x120] sm:$0xff] }
  0x80   :  { %v2411_v36 = vpop.f32.mrf.mxu0 }
  0x82   :  { %v2459_v48 = vpop.f32.mrf.mxu1 }
  0x83   :  { %1922 = vmatmul.msk.f32.gmra.mxu0 %vm109_vm0, %v1874_v37  ;;  %1970 = vmatmul.msk.f32.vlgmr.msrb.gmra.mxu2 %vm109_vm0, %v2459_v48 }
  0x85   :  { %2034 = vmatmul.msk.f32.vlgmr.msrb.gmra.mxu1 %vm109_vm0, %v2411_v36 }
  0x88   :  { %v2419_v38 = vpop.f32.mrf.mxu0 }
  0x8a   :  { %v2478_v54 = vpop.f32.mrf.mxu1 }
  0x8b   :  { %1923 = vmatmul.msk.f32.gmra.mxu0 %vm109_vm0, %v1875_v39  ;;  %v1895_v39 = vld [vmem:[%s3522_s1 + $0x128] sm:$0xff]  ;;  %1971 = vmatmul.msk.f32.gmra.mxu2 %vm109_vm0, %v2478_v54  ;;  %v103_v54 = vld [vmem:[%s3526_s4] sm:$0xff] }
  0x8c   :  { %977 = vmatpush.msra.mxu3 %v103_v54 }
  0x8d   :  { %2035 = vmatmul.msk.f32.gmra.mxu1 %vm109_vm0, %v2419_v38 }
  0x8e   :  { %2115 = vmatpush.msrb.mxu3 %v2383_v29 }
  0x90   :  { %v2427_v40 = vpop.f32.mrf.mxu0 }
  0x92   :  { %v2492_v58 = vpop.f32.mrf.mxu1 }
  0x93   :  { %1924 = vmatmul.msk.f32.gmra.mxu0 %vm109_vm0, %v1876_v41  ;;  %1972 = vmatmul.msk.f32.gmra.mxu2 %vm109_vm0, %v2492_v58 }
  0x95   :  { %2036 = vmatmul.msk.f32.gmra.mxu1 %vm109_vm0, %v2427_v40 }
  0x98   :  { %v2435_v42 = vpop.f32.mrf.mxu0 }
  0x99   :  { %v418_v54 = vmul.f32 %v2435_v42, %v2435_v42 }
  0x9a   :  { %v2507_v62 = vpop.f32.mrf.mxu1 }
  0x9b   :  { %1925 = vmatmul.msk.f32.gmra.mxu0 %vm109_vm0, %v1877_v43  ;;  %1973 = vmatmul.msk.f32.gmra.mxu2 %vm109_vm0, %v2507_v62 }
  0x9d   :  { %2037 = vmatmul.msk.f32.gmra.mxu1 %vm109_vm0, %v2435_v42 }
  0xa0   :  { %v2447_v45 = vpop.f32.mrf.mxu0 }
  0xa2   :  { %v2527_v3 = vpop.f32.mrf.mxu1 }
  0xa3   :  { %1926 = vmatmul.msk.f32.gmra.mxu0 %vm109_vm0, %v1878_v46  ;;  %1974 = vmatmul.msk.f32.gmra.mxu2 %vm109_vm0, %v2527_v3 }
  0xa5   :  { %2038 = vmatmul.msk.f32.gmra.mxu1 %vm109_vm0, %v2447_v45 }
  0xa8   :  { %v2461_v49 = vpop.f32.mrf.mxu0 }
  0xaa   :  { %v2546_v9 = vpop.f32.mrf.mxu1 }
  0xab   :  { %1927 = vmatmul.msk.f32.gmra.mxu0 %vm109_vm0, %v1879_v50  ;;  %v1897_v50 = vld [vmem:[%s3522_s1 + $0x138] sm:$0xff]  ;;  %1975 = vmatmul.msk.f32.gmra.mxu2 %vm109_vm0, %v2546_v9 }
  0xad   :  { %2039 = vmatmul.msk.f32.gmra.mxu1 %vm109_vm0, %v2461_v49 }
  0xb0   :  { %v2473_v52 = vpop.f32.mrf.mxu0 }
  0xb2   :  { %v2556_v12 = vpop.f32.mrf.mxu1 }
  0xb3   :  { %1928 = vmatmul.msk.f32.gmra.mxu0 %vm109_vm0, %v1880_v53  ;;  %1976 = vmatmul.msk.f32.gmra.mxu2 %vm109_vm0, %v2556_v12 }
  0xb5   :  { %2040 = vmatmul.msk.f32.gmra.mxu1 %vm109_vm0, %v2473_v52 }
  0xb8   :  { %v2487_v56 = vpop.f32.mrf.mxu0 }
  0xba   :  { %v2567_v15 = vpop.f32.mrf.mxu1 }
  0xbb   :  { %1929 = vmatmul.msk.f32.gmra.mxu0 %vm109_vm0, %v1881_v57  ;;  %1977 = vmatmul.msk.f32.gmra.mxu2 %vm109_vm0, %v2567_v15 }
  0xbd   :  { %2041 = vmatmul.msk.f32.gmra.mxu1 %vm109_vm0, %v2487_v56 }
  0xc0   :  { %v2501_v60 = vpop.f32.mrf.mxu0 }
  0xc2   :  { %v2579_v18 = vpop.f32.mrf.mxu1 }
  0xc3   :  { %1930 = vmatmul.msk.f32.gmra.mxu0 %vm109_vm0, %v1882_v61  ;;  %1978 = vmatmul.msk.f32.gmra.mxu2 %vm109_vm0, %v2579_v18  ;;  %v106_v18 = vld [vmem:[%s3527_s6 + $0x8] sm:$0xff] }
  0xc4   :  { %1092 = vmatpush.msra.mxu2 %v106_v18 }
  0xc5   :  { %2042 = vmatmul.msk.f32.gmra.mxu1 %vm109_vm0, %v2501_v60 }
  0xc8   :  { %v2515_v0 = vpop.f32.mrf.mxu0 }
  0xca   :  { %v2592_v23 = vpop.f32.mrf.mxu1 }
  0xcb   :  { %1931 = vmatmul.msk.f32.gmra.mxu0 %vm109_vm0, %v1883_v1  ;;  %1979 = vmatmul.msk.f32.gmra.mxu2 %vm109_vm0, %v2592_v23 }
  0xcd   :  { %2043 = vmatmul.msk.f32.gmra.mxu1 %vm109_vm0, %v2515_v0 }
  0xd0   :  { %v2529_v4 = vpop.f32.mrf.mxu0 }
  0xd2   :  { %v2599_v26 = vpop.f32.mrf.mxu1 }
  0xd3   :  { %1932 = vmatmul.msk.f32.gmra.mxu0 %vm109_vm0, %v1884_v5  ;;  %v415_v5 = vmul.f32 %v2411_v36, %v2411_v36  ;;  %1980 = vmatmul.msk.f32.gmra.mxu2 %vm109_vm0, %v2599_v26 }
  0xd5   :  { %2044 = vmatmul.msk.f32.gmra.mxu1 %vm109_vm0, %v2529_v4 }
  0xd8   :  { %v2541_v7 = vpop.f32.mrf.mxu0 }
  0xda   :  { %v2609_v30 = vpop.f32.mrf.mxu1 }
  0xdb   :  { %1933 = vmatmul.msk.f32.gmra.mxu0 %vm109_vm0, %v1885_v8  ;;  %1981 = vmatmul.msk.f32.gmra.mxu2 %vm109_vm0, %v2609_v30  ;;  %v424_v30 = vmul.f32 %v2515_v0, %v2515_v0 }
  0xdd   :  { %2045 = vmatmul.msk.f32.gmra.mxu1 %vm109_vm0, %v2541_v7 }
  0xe0   :  { %v2551_v10 = vpop.f32.mrf.mxu0 }
  0xe2   :  { %v2621_v33 = vpop.f32.mrf.mxu1 }
  0xe3   :  { %1934 = vmatmul.msk.f32.gmra.mxu0 %vm109_vm0, %v1886_v11  ;;  %1982 = vmatmul.msk.f32.gmra.mxu2 %vm109_vm0, %v2621_v33 }
  0xe5   :  { %2046 = vmatmul.msk.f32.gmra.mxu1 %vm109_vm0, %v2551_v10 }
  0xe8   :  { %v2561_v13 = vpop.f32.mrf.mxu0 }
  0xea   :  { %v2636_v41 = vpop.f32.mrf.mxu1 }
  0xeb   :  { %1935 = vmatmul.msk.f32.gmra.mxu0 %vm109_vm0, %v1887_v14  ;;  %v416_v14 = vmul.f32 %v2419_v38, %v2419_v38  ;;  %v417_v38 = vmul.f32 %v2427_v40, %v2427_v40  ;;  %1983 = vmatmul.msk.f32.gmra.mxu2 %vm109_vm0, %v2636_v41  ;;  %v426_v41 = vmul.f32 %v2541_v7, %v2541_v7 }
  0xed   :  { %2047 = vmatmul.msk.f32.gmra.mxu1 %vm109_vm0, %v2561_v13 }
  0xf0   :  { %v2571_v16 = vpop.f32.mrf.mxu0 }
  0xf2   :  { %v2646_v46 = vpop.f32.mrf.mxu1 }
  0xf3   :  { %1936 = vmatmul.msk.f32.gmra.mxu0 %vm109_vm0, %v1888_v17  ;;  %1984 = vmatmul.msk.f32.gmra.mxu2 %vm109_vm0, %v2646_v46  ;;  %v427_v46 = vmul.f32 %v2551_v10, %v2551_v10 }
  0xf5   :  { %2048 = vmatmul.msk.f32.gmra.mxu1 %vm109_vm0, %v2571_v16 }
  0xf8   :  { %v2581_v19 = vpop.f32.mrf.mxu0 }
  0xfa   :  { %v2657_v51 = vpop.f32.mrf.mxu1 }
  0xfb   :  { %1937 = vmatmul.msk.f32.gmra.mxu0 %vm109_vm0, %v1889_v20  ;;  %1985 = vmatmul.msk.f32.gmra.mxu2 %vm109_vm0, %v2657_v51  ;;  %v428_v51 = vmul.f32 %v2561_v13, %v2561_v13 }
  0xfd   :  { %2049 = vmatmul.msk.f32.gmra.mxu1 %vm109_vm0, %v2581_v19 }
 0x100   :  { %v319_v21 = vpop.f32.mrf.mxu0 }
 0x101   :  { %v431_v58 = vmul.f32 %v319_v21, %v319_v21 }
 0x103   :  { %1938 = vmatmul.msk.f32.gmra.mxu0 %vm109_vm0, %v1890_v22  ;;  %v447_v6 = vadd.f32 %v431_v58, %v415_v5 }
 0x105   :  { %2050 = vmatmul.msk.f32.gmra.mxu1 %vm109_vm0, %v319_v21 }
 0x108   :  { %v322_v24 = vpop.f32.mrf.mxu0 }
 0x109   :  { %v432_v11 = vmul.f32 %v322_v24, %v322_v24 }
 0x10b   :  { %1939 = vmatmul.msk.f32.gmra.mxu0 %vm109_vm0, %v1891_v25  ;;  %v448_v36 = vadd.f32 %v432_v11, %v416_v14 }
 0x10d   :  { %2051 = vmatmul.msk.f32.gmra.mxu1 %vm109_vm0, %v322_v24 }
 0x110   :  { %v2603_v27 = vpop.f32.mrf.mxu0 }
 0x111   :  { %v433_v22 = vmul.f32 %v2603_v27, %v2603_v27 }
 0x113   :  { %1940 = vmatmul.msk.f32.gmra.mxu0 %vm109_vm0, %v1892_v28  ;;  %v449_v28 = vadd.f32 %v433_v22, %v417_v38 }
 0x115   :  { %2052 = vmatmul.msk.f32.gmra.mxu1 %vm109_vm0, %v2603_v27 }
 0x118   :  { %v2613_v31 = vpop.f32.mrf.mxu0 }
 0x119   :  { %v434_v59 = vmul.f32 %v2613_v31, %v2613_v31 }
 0x11b   :  { %1941 = vmatmul.msk.f32.gmra.mxu0 %vm109_vm0, %v1893_v32  ;;  %v450_v11 = vadd.f32 %v434_v59, %v418_v54 }
 0x11d   :  { %2053 = vmatmul.msk.f32.gmra.mxu1 %vm109_vm0, %v2613_v31 }
 0x120   :  { %v2623_v34 = vpop.f32.mrf.mxu0 }
 0x121   :  { %v435_v22 = vmul.f32 %v2623_v34, %v2623_v34 }
 0x123   :  { %1942 = vmatmul.msk.f32.gmra.mxu0 %vm109_vm0, %v1894_v35 }
 0x125   :  { %2054 = vmatmul.msk.f32.gmra.mxu1 %vm109_vm0, %v2623_v34 }
 0x128   :  { %v2631_v37 = vpop.f32.mrf.mxu0 }
 0x129   :  { %v436_v23 = vmul.f32 %v2631_v37, %v2631_v37 }
 0x12b   :  { %1943 = vmatmul.msk.f32.gmra.mxu0 %vm109_vm0, %v1895_v39 }
 0x12d   :  { %2055 = vmatmul.msk.f32.gmra.mxu1 %vm109_vm0, %v2631_v37 }
 0x130   :  { %v2641_v43 = vpop.f32.mrf.mxu0 }
 0x133   :  { %1944 = vmatmul.msk.f32.gmra.mxu0 %vm109_vm0, %v1896_v44 }
 0x135   :  { %2056 = vmatmul.msk.f32.gmra.mxu1 %vm109_vm0, %v2641_v43 }
 0x138   :  { %v2651_v47 = vpop.f32.mrf.mxu0 }
 0x13b   :  { %1945 = vmatmul.msk.f32.gmra.mxu0 %vm109_vm0, %v1897_v50 }
 0x13d   :  { %2057 = vmatmul.msk.f32.gmra.mxu1 %vm109_vm0, %v2651_v47 }
 0x140   :  { %v2661_v53 = vpop.f32.mrf.mxu0 }
 0x148   :  { %v2663_v55 = vpop.f32.mrf.mxu0 }
 0x150   :  { %v2665_v57 = vpop.f32.mrf.mxu0 }
 0x158   :  { %v2672_v61 = vpop.f32.mrf.mxu0 }
 0x160   :  { %v2676_v63 = vpop.f32.mrf.mxu0 }
 0x168   :  { %v2680_v1 = vpop.f32.mrf.mxu0 }
 0x170   :  { %v2684_v2 = vpop.f32.mrf.mxu0 }
 0x178   :  { %v2688_v48 = vpop.f32.mrf.mxu0 }
 0x180   :  { %v2698_v62 = vpop.f32.mrf.mxu0 }
 0x181   :  { %v463_v3 = vmul.f32 %v2698_v62, %v2698_v62 }
 0x183   :  { %v479_v8 = vadd.f32 %v463_v3, %v447_v6 }
 0x185   :  { %2117 = vrsqrt.f32 %v479_v8  ;;  %vm502_vm2 = vcmp.eq.f32.partialorder %v479_v8, inf  ;;  %v505_v58 = vand.u32 2147483648, %v479_v8  ;;  %vm504_vm3 = vcmp.eq.f32.partialorder %v479_v8, 0.0 }
 0x188   :  { %v2706_v29 = vpop.f32.mrf.mxu0 }
 0x189   :  { %v464_v9 = vmul.f32 %v2706_v29, %v2706_v29 }
 0x18b   :  { %v2118_v17 = vpop.eup %2117  ;;  %v480_v20 = vadd.f32 %v464_v9, %v448_v36 }
 0x18c   :  { %v496_v21 = vmul.f32 %v2118_v17, %v479_v8 }
 0x18d   :  { %2119 = vrsqrt.f32 %v480_v20  ;;  %vm514_vm4 = vcmp.eq.f32.partialorder %v480_v20, inf  ;;  %vm516_vm5 = vcmp.eq.f32.partialorder %v480_v20, 0.0 }
 0x18e   :  { %v497_v24 = vmul.f32 %v2118_v17, %v496_v21 }
 0x190   :  { %v2716_v12 = vpop.f32.mrf.mxu0  ;;  %v498_v25 = vmul.f32 0.5, %v497_v24 }
 0x191   :  { %v465_v32 = vmul.f32 %v2716_v12, %v2716_v12 }
 0x192   :  { %v499_v35 = vsub.f32 1.5, %v498_v25  ;;  %v419_v25 = vmul.f32 %v2447_v45, %v2447_v45 }
 0x193   :  { %v2120_v39 = vpop.eup %2119  ;;  %v2720_v44 = vadd.f32 %v465_v32, %v449_v28  ;;  %v517_v28 = vand.u32 2147483648, %v480_v20 }
 0x194   :  { %v500_v27 = vmul.f32 %v2118_v17, %v499_v35  ;;  %v508_v50 = vmul.f32 %v2120_v39, %v480_v20  ;;  %v2739_v17 = vpop.f32.mrf.mxu2 }
 0x195   :  { %2121 = vrsqrt.f32 %v2720_v44  ;;  %vm526_vm6 = vcmp.eq.f32.partialorder %v2720_v44, inf  ;;  %vm528_vm7 = vcmp.eq.f32.partialorder %v2720_v44, 0.0 }
 0x196   :  { %v501_v40 = vmul.f32 %v500_v27, %v479_v8  ;;  %v509_v15 = vmul.f32 %v2120_v39, %v508_v50  ;;  %v451_v27 = vadd.f32 %v435_v22, %v419_v25 }
 0x198   :  { %v2729_v5 = vpop.f32.mrf.mxu0  ;;  %v503_v6 = vsel %vm502_vm2, %v479_v8, %v501_v40  ;;  %v510_v3 = vmul.f32 0.5, %v509_v15 }
 0x199   :  { %v466_v31 = vmul.f32 %v2729_v5, %v2729_v5  ;;  %v506_v14 = vsel %vm504_vm3, %v505_v58, %v503_v6 }
 0x19a   :  { %1986 = vmatmul.msk.f32.vlgmr.msra.gmra.mxu3 %vm109_vm0, %v506_v14  ;;  %v511_v36 = vsub.f32 1.5, %v510_v3  ;;  %v420_v3 = vmul.f32 %v2461_v49, %v2461_v49  ;;  %v423_v49 = vmul.f32 %v2501_v60, %v2501_v60  ;;  %v437_v60 = vmul.f32 %v2641_v43, %v2641_v43 }
 0x19b   :  { %v2122_v9 = vpop.eup %2121  ;;  %v2734_v42 = vadd.f32 %v466_v31, %v450_v11  ;;  %v439_v11 = vmul.f32 %v2661_v53, %v2661_v53  ;;  %v529_v31 = vand.u32 2147483648, %v2720_v44  ;;  %v440_v43 = vmul.f32 %v2663_v55, %v2663_v55 }
 0x19c   :  { %v512_v21 = vmul.f32 %v2120_v39, %v511_v36  ;;  %v520_v8 = vmul.f32 %v2122_v9, %v2720_v44 }
 0x19d   :  { %2123 = vrsqrt.f32 %v2734_v42  ;;  %v455_v26 = vadd.f32 %v439_v11, %v423_v49  ;;  %vm538_vm8 = vcmp.eq.f32.partialorder %v2734_v42, inf  ;;  %vm540_vm9 = vcmp.eq.f32.partialorder %v2734_v42, 0.0 }
 0x19e   :  { %v513_v24 = vmul.f32 %v512_v21, %v480_v20  ;;  %v521_v38 = vmul.f32 %v2122_v9, %v520_v8 }
 0x1a0   :  { %v2749_v32 = vpop.f32.mrf.mxu0  ;;  %v515_v35 = vsel %vm514_vm4, %v480_v20, %v513_v24  ;;  %v522_v39 = vmul.f32 0.5, %v521_v38  ;;  %v2760_v20 = vpop.f32.mrf.mxu2  ;;  %v471_v24 = vmul.f32 %v2739_v17, %v2739_v17 }
 0x1a1   :  { %v467_v34 = vmul.f32 %v2749_v32, %v2749_v32  ;;  %v518_v50 = vsel %vm516_vm5, %v517_v28, %v515_v35 }
 0x1a2   :  { %1987 = vmatmul.msk.f32.gmra.mxu3 %vm109_vm0, %v518_v50  ;;  %v523_v59 = vsub.f32 1.5, %v522_v39  ;;  %v421_v39 = vmul.f32 %v2473_v52, %v2473_v52 }
 0x1a3   :  { %v2124_v40 = vpop.eup %2123  ;;  %v2754_v45 = vadd.f32 %v467_v34, %v451_v27  ;;  %v2791_v27 = vadd.f32 %v471_v24, %v455_v26  ;;  %v541_v34 = vand.u32 2147483648, %v2734_v42 }
 0x1a4   :  { %v524_v15 = vmul.f32 %v2122_v9, %v523_v59  ;;  %v532_v54 = vmul.f32 %v2124_v40, %v2734_v42  ;;  %v452_v9 = vadd.f32 %v436_v23, %v420_v3  ;;  %v472_v3 = vmul.f32 %v2760_v20, %v2760_v20 }
 0x1a5   :  { %2125 = vrsqrt.f32 %v2754_v45  ;;  %vm550_vm10 = vcmp.eq.f32.partialorder %v2754_v45, inf  ;;  %vm552_vm11 = vcmp.eq.f32.partialorder %v2754_v45, 0.0  ;;  %vm598_vm4 = vcmp.eq.f32.partialorder %v2791_v27, inf }
 0x1a6   :  { %v525_v58 = vmul.f32 %v524_v15, %v2720_v44  ;;  %v533_v6 = vmul.f32 %v2124_v40, %v532_v54  ;;  %v453_v15 = vadd.f32 %v437_v60, %v421_v39  ;;  %vm600_vm5 = vcmp.eq.f32.partialorder %v2791_v27, 0.0 }
 0x1a8   :  { %v2771_v37 = vpop.f32.mrf.mxu0  ;;  %v527_v14 = vsel %vm526_vm6, %v2720_v44, %v525_v58  ;;  %v534_v36 = vmul.f32 0.5, %v533_v6  ;;  %v2799_v50 = vpop.f32.mrf.mxu2 }
 0x1a9   :  { %v468_v18 = vmul.f32 %v2771_v37, %v2771_v37  ;;  %v530_v21 = vsel %vm528_vm7, %v529_v31, %v527_v14  ;;  %v456_v31 = vadd.f32 %v440_v43, %v424_v30 }
 0x1aa   :  { %1988 = vmatmul.msk.f32.gmra.mxu3 %vm109_vm0, %v530_v21  ;;  %v535_v8 = vsub.f32 1.5, %v534_v36  ;;  %v438_v36 = vmul.f32 %v2651_v47, %v2651_v47 }
 0x1ab   :  { %v2126_v22 = vpop.eup %2125  ;;  %v2782_v38 = vadd.f32 %v468_v18, %v452_v9  ;;  %v422_v9 = vmul.f32 %v2487_v56, %v2487_v56  ;;  %v553_v18 = vand.u32 2147483648, %v2754_v45  ;;  %v2826_v21 = vadd.f32 %v472_v3, %v456_v31 }
 0x1ac   :  { %v536_v44 = vmul.f32 %v2124_v40, %v535_v8  ;;  %v544_v25 = vmul.f32 %v2126_v22, %v2754_v45  ;;  %v441_v56 = vmul.f32 %v2665_v57, %v2665_v57 }
 0x1ad   :  { %2127 = vrsqrt.f32 %v2782_v38  ;;  %v454_v26 = vadd.f32 %v438_v36, %v422_v9  ;;  %vm562_vm12 = vcmp.eq.f32.partialorder %v2782_v38, inf  ;;  %vm564_vm13 = vcmp.eq.f32.partialorder %v2782_v38, 0.0 }
 0x1ae   :  { %v537_v28 = vmul.f32 %v536_v44, %v2734_v42  ;;  %v545_v35 = vmul.f32 %v2126_v22, %v544_v25  ;;  %2129 = vrsqrt.f32 %v2791_v27  ;;  %vm610_vm6 = vcmp.eq.f32.partialorder %v2826_v21, inf }
 0x1af   :  { %vm612_vm7 = vcmp.eq.f32.partialorder %v2826_v21, 0.0 }
 0x1b0   :  { %v2801_v59 = vpop.f32.mrf.mxu0  ;;  %v539_v40 = vsel %vm538_vm8, %v2734_v42, %v537_v28  ;;  %v546_v52 = vmul.f32 0.5, %v545_v35  ;;  %v2836_v60 = vpop.f32.mrf.mxu2  ;;  %v425_v35 = vmul.f32 %v2529_v4, %v2529_v4  ;;  %v565_v4 = vand.u32 2147483648, %v2782_v38 }
 0x1b1   :  { %v469_v54 = vmul.f32 %v2801_v59, %v2801_v59  ;;  %v542_v23 = vsel %vm540_vm9, %v541_v34, %v539_v40  ;;  %v473_v40 = vmul.f32 %v2799_v50, %v2799_v50 }
 0x1b2   :  { %1989 = vmatmul.msk.f32.gmra.mxu3 %vm109_vm0, %v542_v23  ;;  %v547_v58 = vsub.f32 1.5, %v546_v52  ;;  %v457_v43 = vadd.f32 %v441_v56, %v425_v35 }
 0x1b3   :  { %v2128_v6 = vpop.eup %2127  ;;  %v2812_v11 = vadd.f32 %v469_v54, %v453_v15 }
 0x1b4   :  { %v548_v42 = vmul.f32 %v2126_v22, %v547_v58  ;;  %v556_v14 = vmul.f32 %v2128_v6, %v2782_v38  ;;  %v2130_v25 = vpop.eup %2129  ;;  %v2856_v58 = vadd.f32 %v473_v40, %v457_v43 }
 0x1b5   :  { %2131 = vrsqrt.f32 %v2812_v11  ;;  %v592_v54 = vmul.f32 %v2130_v25, %v2791_v27  ;;  %vm574_vm14 = vcmp.eq.f32.partialorder %v2812_v11, inf  ;;  %v577_v7 = vand.u32 2147483648, %v2812_v11 }
 0x1b6   :  { %v549_v0 = vmul.f32 %v548_v42, %v2754_v45  ;;  %v557_v49 = vmul.f32 %v2128_v6, %v556_v14  ;;  %2133 = vrsqrt.f32 %v2826_v21  ;;  %vm576_vm15 = vcmp.eq.f32.partialorder %v2812_v11, 0.0 }
 0x1b7   :  { %v593_v14 = vmul.f32 %v2130_v25, %v592_v54  ;;  %vm622_vm8 = vcmp.eq.f32.partialorder %v2856_v58, inf  ;;  %vm624_vm9 = vcmp.eq.f32.partialorder %v2856_v58, 0.0 }
 0x1b8   :  { %v2828_v8 = vpop.f32.mrf.mxu0  ;;  %v551_v47 = vsel %vm550_vm10, %v2754_v45, %v549_v0  ;;  %v558_v22 = vmul.f32 0.5, %v557_v49  ;;  %v2863_v0 = vpop.f32.mrf.mxu2 }
 0x1b9   :  { %v470_v24 = vmul.f32 %v2828_v8, %v2828_v8  ;;  %v554_v44 = vsel %vm552_vm11, %v553_v18, %v551_v47  ;;  %v474_v18 = vmul.f32 %v2836_v60, %v2836_v60 }
 0x1ba   :  { %1990 = vmatmul.msk.f32.gmra.mxu3 %vm109_vm0, %v554_v44  ;;  %v559_v33 = vsub.f32 1.5, %v558_v22 }
 0x1bb   :  { %v2132_v28 = vpop.eup %2131  ;;  %v2841_v45 = vadd.f32 %v470_v24, %v454_v26  ;;  %v594_v26 = vmul.f32 0.5, %v593_v14  ;;  %v444_v14 = vmul.f32 %v2680_v1, %v2680_v1 }
 0x1bc   :  { %v560_v39 = vmul.f32 %v2128_v6, %v559_v33  ;;  %v568_v34 = vmul.f32 %v2132_v28, %v2812_v11  ;;  %v442_v6 = vmul.f32 %v2672_v61, %v2672_v61  ;;  %v2134_v31 = vpop.eup %2133 }
 0x1bd   :  { %2135 = vrsqrt.f32 %v2841_v45  ;;  %v604_v56 = vmul.f32 %v2134_v31, %v2826_v21  ;;  %vm586_vm2 = vcmp.eq.f32.partialorder %v2841_v45, inf  ;;  %vm588_vm3 = vcmp.eq.f32.partialorder %v2841_v45, 0.0 }
 0x1be   :  { %v561_v52 = vmul.f32 %v560_v39, %v2782_v38  ;;  %v569_v15 = vmul.f32 %v2132_v28, %v568_v34  ;;  %v458_v9 = vadd.f32 %v442_v6, %v426_v41  ;;  %2137 = vrsqrt.f32 %v2856_v58 }
 0x1bf   :  { %v595_v34 = vsub.f32 1.5, %v594_v26  ;;  %v605_v43 = vmul.f32 %v2134_v31, %v604_v56  ;;  %v601_v56 = vand.u32 2147483648, %v2791_v27 }
 0x1c0   :  { %v563_v23 = vsel %vm562_vm12, %v2782_v38, %v561_v52  ;;  %v570_v30 = vmul.f32 0.5, %v569_v15  ;;  %v2877_v33 = vadd.f32 %v474_v18, %v458_v9  ;;  %v2887_v54 = vpop.f32.mrf.mxu2  ;;  %v460_v9 = vadd.f32 %v444_v14, %v428_v51 }
 0x1c1   :  { %v566_v3 = vsel %vm564_vm13, %v565_v4, %v563_v23  ;;  %v596_v23 = vmul.f32 %v2130_v25, %v595_v34 }
 0x1c2   :  { %1991 = vmatmul.msk.f32.gmra.mxu3 %vm109_vm0, %v566_v3  ;;  %v571_v42 = vsub.f32 1.5, %v570_v30  ;;  %2139 = vrsqrt.f32 %v2877_v33  ;;  %v606_v30 = vmul.f32 0.5, %v605_v43  ;;  %v589_v3 = vand.u32 2147483648, %v2841_v45 }
 0x1c3   :  { %v2136_v36 = vpop.eup %2135  ;;  %vm634_vm10 = vcmp.eq.f32.partialorder %v2877_v33, inf  ;;  %vm636_vm11 = vcmp.eq.f32.partialorder %v2877_v33, 0.0 }
 0x1c4   :  { %v572_v49 = vmul.f32 %v2132_v28, %v571_v42  ;;  %v580_v38 = vmul.f32 %v2136_v36, %v2841_v45  ;;  %v443_v28 = vmul.f32 %v2676_v63, %v2676_v63  ;;  %v2138_v40 = vpop.eup %2137  ;;  %v607_v41 = vsub.f32 1.5, %v606_v30 }
 0x1c5   :  { %v616_v6 = vmul.f32 %v2138_v40, %v2856_v58  ;;  %v446_v30 = vmul.f32 %v2688_v48, %v2688_v48 }
 0x1c6   :  { %v573_v47 = vmul.f32 %v572_v49, %v2812_v11  ;;  %v581_v22 = vmul.f32 %v2136_v36, %v580_v38  ;;  %v459_v15 = vadd.f32 %v443_v28, %v427_v46 }
 0x1c7   :  { %v617_v49 = vmul.f32 %v2138_v40, %v616_v6 }
 0x1c8   :  { %v575_v24 = vsel %vm574_vm14, %v2812_v11, %v573_v47  ;;  %v582_v44 = vmul.f32 0.5, %v581_v22  ;;  %v475_v11 = vmul.f32 %v2863_v0, %v2863_v0  ;;  %v2140_v38 = vpop.eup %2139  ;;  %v608_v47 = vmul.f32 %v2134_v31, %v607_v41 }
 0x1c9   :  { %v578_v35 = vsel %vm576_vm15, %v577_v7, %v575_v24  ;;  %v618_v22 = vmul.f32 0.5, %v617_v49  ;;  %v628_v26 = vmul.f32 %v2140_v38, %v2877_v33  ;;  %v2912_v7 = vpop.f32.mrf.mxu2  ;;  %v445_v24 = vmul.f32 %v2684_v2, %v2684_v2 }
 0x1ca   :  { %1992 = vmatmul.msk.f32.gmra.mxu3 %vm109_vm0, %v578_v35  ;;  %v583_v39 = vsub.f32 1.5, %v582_v44  ;;  %v2897_v42 = vadd.f32 %v475_v11, %v459_v15  ;;  %v609_v28 = vmul.f32 %v608_v47, %v2826_v21  ;;  %v477_v46 = vmul.f32 %v2912_v7, %v2912_v7 }
 0x1cb   :  { %v619_v31 = vsub.f32 1.5, %v618_v22  ;;  %v629_v35 = vmul.f32 %v2140_v38, %v628_v26 }
 0x1cc   :  { %v584_v52 = vmul.f32 %v2136_v36, %v583_v39  ;;  %v597_v36 = vmul.f32 %v596_v23, %v2791_v27  ;;  %2141 = vrsqrt.f32 %v2897_v42  ;;  %v105_v39 = vld [vmem:[%s3527_s6] sm:$0xff]  ;;  %v613_v23 = vand.u32 2147483648, %v2826_v21 }
 0x1cd   :  { %1093 = vmatpush.msra.mxu2 %v105_v39  ;;  %v620_v15 = vmul.f32 %v2138_v40, %v619_v31  ;;  %v630_v11 = vmul.f32 0.5, %v629_v35  ;;  %vm646_vm12 = vcmp.eq.f32.partialorder %v2897_v42, inf  ;;  %vm648_vm13 = vcmp.eq.f32.partialorder %v2897_v42, 0.0 }
 0x1ce   :  { %v585_v4 = vmul.f32 %v584_v52, %v2841_v45  ;;  %v599_v18 = vsel %vm598_vm4, %v2791_v27, %v597_v36  ;;  %v429_v27 = vmul.f32 %v2571_v16, %v2571_v16  ;;  %v611_v52 = vsel %vm610_vm6, %v2826_v21, %v609_v28 }
 0x1cf   :  { %v602_v44 = vsel %vm600_vm5, %v601_v56, %v599_v18  ;;  %v614_v6 = vsel %vm612_vm7, %v613_v23, %v611_v52  ;;  %v631_v40 = vsub.f32 1.5, %v630_v11  ;;  %v430_v36 = vmul.f32 %v2581_v19, %v2581_v19 }
 0x1d0   :  { %v587_v10 = vsel %vm586_vm2, %v2841_v45, %v585_v4  ;;  %v476_v45 = vmul.f32 %v2887_v54, %v2887_v54  ;;  %v461_v43 = vadd.f32 %v445_v24, %v429_v27  ;;  %v625_v18 = vand.u32 2147483648, %v2856_v58 }
 0x1d1   :  { %v590_v25 = vsel %vm588_vm3, %v589_v3, %v587_v10  ;;  %v2938_v3 = vpop.f32.mrf.mxu2  ;;  %v621_v10 = vmul.f32 %v620_v15, %v2856_v58  ;;  %v462_v41 = vadd.f32 %v446_v30, %v430_v36  ;;  %v632_v51 = vmul.f32 %v2140_v38, %v631_v40 }
 0x1d2   :  { %1993 = vmatmul.msk.f32.gmra.mxu3 %vm109_vm0, %v590_v25  ;;  %v2915_v13 = vadd.f32 %v476_v45, %v460_v9  ;;  %v2142_v34 = vpop.eup %2141  ;;  %v2934_v16 = vadd.f32 %v477_v46, %v461_v43  ;;  %v478_v21 = vmul.f32 %v2938_v3, %v2938_v3 }
 0x1d3   :  { %v640_v4 = vmul.f32 %v2142_v34, %v2897_v42  ;;  %v623_v49 = vsel %vm622_vm8, %v2856_v58, %v621_v10  ;;  %v633_v22 = vmul.f32 %v632_v51, %v2877_v33  ;;  %v637_v58 = vand.u32 2147483648, %v2877_v33 }
 0x1d4   :  { %2143 = vrsqrt.f32 %v2915_v13  ;;  %v494_v47 = vadd.f32 %v478_v21, %v462_v41  ;;  %v626_v19 = vsel %vm624_vm9, %v625_v18, %v623_v49  ;;  %vm658_vm14 = vcmp.eq.f32.partialorder %v2915_v13, inf }
 0x1d5   :  { %v641_v14 = vmul.f32 %v2142_v34, %v640_v4  ;;  %2145 = vrsqrt.f32 %v2934_v16  ;;  %v635_v38 = vsel %vm634_vm10, %v2877_v33, %v633_v22  ;;  %v649_v4 = vand.u32 2147483648, %v2897_v42 }
 0x1d6   :  { %2147 = vrsqrt.f32 %v494_v47  ;;  %v638_v35 = vsel %vm636_vm11, %v637_v58, %v635_v38  ;;  %v661_v36 = vand.u32 2147483648, %v2915_v13  ;;  %vm660_vm15 = vcmp.eq.f32.partialorder %v2915_v13, 0.0 }
 0x1d7   :  { %v642_v9 = vmul.f32 0.5, %v641_v14  ;;  %vm670_vm2 = vcmp.eq.f32.partialorder %v2934_v16, inf  ;;  %vm672_vm3 = vcmp.eq.f32.partialorder %v2934_v16, 0.0  ;;  %vm682_vm4 = vcmp.eq.f32.partialorder %v494_v47, inf }
 0x1d8   :  { %v685_v22 = vand.u32 2147483648, %v494_v47  ;;  %vm684_vm5 = vcmp.eq.f32.partialorder %v494_v47, 0.0 }
 0x1d9   :  { %v643_v26 = vsub.f32 1.5, %v642_v9  ;;  %v866_v10 = vpop.f32.mrf.mxu2  ;;  %v673_v9 = vand.u32 2147483648, %v2934_v16 }
 0x1da   :  { %1994 = vmatmul.msk.f32.gmra.mxu3 %vm109_vm0, %v602_v44  ;;  %v2144_v25 = vpop.eup %2143 }
 0x1db   :  { %v652_v45 = vmul.f32 %v2144_v25, %v2915_v13  ;;  %v2146_v24 = vpop.eup %2145  ;;  %v644_v44 = vmul.f32 %v2142_v34, %v643_v26 }
 0x1dc   :  { %v664_v31 = vmul.f32 %v2146_v24, %v2934_v16  ;;  %v2148_v46 = vpop.eup %2147 }
 0x1dd   :  { %v653_v56 = vmul.f32 %v2144_v25, %v652_v45  ;;  %v645_v39 = vmul.f32 %v644_v44, %v2897_v42  ;;  %v676_v11 = vmul.f32 %v2148_v46, %v494_v47 }
 0x1de   :  { %v665_v43 = vmul.f32 %v2146_v24, %v664_v31 }
 0x1df   :  { %v654_v28 = vmul.f32 0.5, %v653_v56  ;;  %v647_v52 = vsel %vm646_vm12, %v2897_v42, %v645_v39 }
 0x1e0   :  { %v666_v15 = vmul.f32 0.5, %v665_v43  ;;  %v650_v33 = vsel %vm648_vm13, %v649_v4, %v647_v52 }
 0x1e1   :  { %v655_v27 = vsub.f32 1.5, %v654_v28  ;;  %v869_v45 = vpop.f32.mrf.mxu2 }
 0x1e2   :  { %1995 = vmatmul.msk.f32.gmra.mxu3 %vm109_vm0, %v614_v6  ;;  %v667_v30 = vsub.f32 1.5, %v666_v15  ;;  %v677_v6 = vmul.f32 %v2148_v46, %v676_v11 }
 0x1e3   :  { %v656_v34 = vmul.f32 %v2144_v25, %v655_v27 }
 0x1e4   :  { %v668_v14 = vmul.f32 %v2146_v24, %v667_v30  ;;  %v678_v25 = vmul.f32 0.5, %v677_v6  ;;  %v2979_v24 = vpop.f32.mrf.mxu1 }
 0x1e5   :  { %v657_v23 = vmul.f32 %v656_v34, %v2915_v13 }
 0x1e6   :  { %v669_v42 = vmul.f32 %v668_v14, %v2934_v16  ;;  %v679_v21 = vsub.f32 1.5, %v678_v25 }
 0x1e7   :  { %v659_v40 = vsel %vm658_vm14, %v2915_v13, %v657_v23 }
 0x1e8   :  { %v662_v41 = vsel %vm660_vm15, %v661_v36, %v659_v40  ;;  %v671_v49 = vsel %vm670_vm2, %v2934_v16, %v669_v42  ;;  %v680_v51 = vmul.f32 %v2148_v46, %v679_v21 }
 0x1e9   :  { %v674_v18 = vsel %vm672_vm3, %v673_v9, %v671_v49  ;;  %v872_v56 = vpop.f32.mrf.mxu2 }
 0x1ea   :  { %1996 = vmatmul.msk.f32.gmra.mxu3 %vm109_vm0, %v626_v19  ;;  %v681_v13 = vmul.f32 %v680_v51, %v494_v47 }
 0x1ec   :  { %v683_v19 = vsel %vm682_vm4, %v494_v47, %v681_v13  ;;  %v2983_v44 = vpop.f32.mrf.mxu1 }
 0x1ed   :  { %v686_v26 = vsel %vm684_vm5, %v685_v22, %v683_v19 }
 0x1f1   :  { %v875_v38 = vpop.f32.mrf.mxu2 }
 0x1f2   :  { %1997 = vmatmul.msk.f32.gmra.mxu3 %vm109_vm0, %v638_v35 }
 0x1f4   :  { %v2992_v35 = vpop.f32.mrf.mxu1 }
 0x1f9   :  { %v878_v31 = vpop.f32.mrf.mxu2 }
 0x1fa   :  { %1998 = vmatmul.msk.f32.gmra.mxu3 %vm109_vm0, %v650_v33 }
 0x201   :  { %v881_v27 = vpop.f32.mrf.mxu2 }
 0x202   :  { %1999 = vmatmul.msk.f32.gmra.mxu3 %vm109_vm0, %v662_v41 }
 0x20a   :  { %2000 = vmatmul.msk.f32.gmra.mxu3 %vm109_vm0, %v674_v18 }
 0x212   :  { %2001 = vmatmul.msk.f32.gmra.mxu3 %vm109_vm0, %v686_v26 }
 0x21a   :  { %2058 = vmatmul.msk.f32.vlgmr.msrb.gmra.mxu3 %vm109_vm0, %v2661_v53 }
 0x21d   :  { %v979_v16 = vpop.f32.mrf.mxu3 }
 0x21e   :  { %v980_v28 = vadd.f32 %v979_v16, %v866_v10 }
 0x220   :  { %1800 = vst.msk [vmem:[%s3528_s9] sm:$0xff] %vm687_vm1, %v980_v28  ;;  %2002 = vmatmul.msk.f32.vlgmr.msra.gmra.mxu2 %vm687_vm1, %v980_v28 }
 0x222   :  { %2059 = vmatmul.msk.f32.gmra.mxu3 %vm109_vm0, %v2663_v55  ;;  %v3006_v55 = vpop.f32.mrf.mxu1 }
 0x225   :  { %v982_v47 = vpop.f32.mrf.mxu3 }
 0x226   :  { %v983_v58 = vadd.f32 %v982_v47, %v869_v45 }
 0x228   :  { %1801 = vst.msk [vmem:[%s3528_s9 + $0x8] sm:$0xff] %vm687_vm1, %v983_v58  ;;  %2003 = vmatmul.msk.f32.gmra.mxu2 %vm687_vm1, %v983_v58 }
 0x22a   :  { %2060 = vmatmul.msk.f32.gmra.mxu3 %vm109_vm0, %v2665_v57  ;;  %v884_v57 = vpop.f32.mrf.mxu2  ;;  %v3017_v52 = vpop.f32.mrf.mxu1 }
 0x22d   :  { %v985_v53 = vpop.f32.mrf.mxu3 }
 0x22e   :  { %v986_v39 = vadd.f32 %v985_v53, %v872_v56 }
 0x230   :  { %1802 = vst.msk [vmem:[%s3528_s9 + $0x10] sm:$0xff] %vm687_vm1, %v986_v39  ;;  %2004 = vmatmul.msk.f32.gmra.mxu2 %vm687_vm1, %v986_v39 }
 0x232   :  { %2061 = vmatmul.msk.f32.gmra.mxu3 %vm109_vm0, %v2672_v61  ;;  %v887_v61 = vpop.f32.mrf.mxu2  ;;  %v3026_v11 = vpop.f32.mrf.mxu1 }
 0x235   :  { %v988_v43 = vpop.f32.mrf.mxu3 }
 0x236   :  { %v989_v46 = vadd.f32 %v988_v43, %v875_v38 }
 0x238   :  { %1803 = vst.msk [vmem:[%s3528_s9 + $0x18] sm:$0xff] %vm687_vm1, %v989_v46  ;;  %2005 = vmatmul.msk.f32.gmra.mxu2 %vm687_vm1, %v989_v46 }
 0x23a   :  { %2062 = vmatmul.msk.f32.gmra.mxu3 %vm109_vm0, %v2676_v63  ;;  %v890_v23 = vpop.f32.mrf.mxu2  ;;  %v3035_v6 = vpop.f32.mrf.mxu1 }
 0x23d   :  { %v991_v34 = vpop.f32.mrf.mxu3 }
 0x23e   :  { %v992_v15 = vadd.f32 %v991_v34, %v878_v31 }
 0x240   :  { %1804 = vst.msk [vmem:[%s3528_s9 + $0x20] sm:$0xff] %vm687_vm1, %v992_v15  ;;  %2006 = vmatmul.msk.f32.gmra.mxu2 %vm687_vm1, %v992_v15 }
 0x242   :  { %2063 = vmatmul.msk.f32.gmra.mxu3 %vm109_vm0, %v2680_v1  ;;  %v893_v40 = vpop.f32.mrf.mxu2 }
 0x245   :  { %v994_v4 = vpop.f32.mrf.mxu3 }
 0x246   :  { %v995_v33 = vadd.f32 %v994_v4, %v881_v27 }
 0x248   :  { %1805 = vst.msk [vmem:[%s3528_s9 + $0x28] sm:$0xff] %vm687_vm1, %v995_v33  ;;  %2007 = vmatmul.msk.f32.gmra.mxu2 %vm687_vm1, %v995_v33 }
 0x24a   :  { %2064 = vmatmul.msk.f32.gmra.mxu3 %vm109_vm0, %v2684_v2  ;;  %v3049_v2 = vpop.f32.mrf.mxu1 }
 0x24d   :  { %v997_v63 = vpop.f32.mrf.mxu3 }
 0x24e   :  { %v998_v30 = vadd.f32 %v997_v63, %v884_v57 }
 0x250   :  { %1806 = vst.msk [vmem:[%s3528_s9 + $0x30] sm:$0xff] %vm687_vm1, %v998_v30  ;;  %2008 = vmatmul.msk.f32.gmra.mxu2 %vm687_vm1, %v998_v30 }
 0x252   :  { %2065 = vmatmul.msk.f32.gmra.mxu3 %vm109_vm0, %v2688_v48  ;;  %v896_v48 = vpop.f32.mrf.mxu2  ;;  %v3060_v36 = vpop.f32.mrf.mxu1 }
 0x255   :  { %v1000_v1 = vpop.f32.mrf.mxu3 }
 0x256   :  { %v1001_v10 = vadd.f32 %v1000_v1, %v887_v61 }
 0x258   :  { %1807 = vst.msk [vmem:[%s3528_s9 + $0x38] sm:$0xff] %vm687_vm1, %v1001_v10  ;;  %2009 = vmatmul.msk.f32.gmra.mxu2 %vm687_vm1, %v1001_v10 }
 0x25a   :  { %2066 = vmatmul.msk.f32.gmra.mxu3 %vm109_vm0, %v2698_v62  ;;  %v899_v62 = vpop.f32.mrf.mxu2  ;;  %v3069_v21 = vpop.f32.mrf.mxu1 }
 0x25d   :  { %v1003_v14 = vpop.f32.mrf.mxu3 }
 0x25e   :  { %v1004_v25 = vadd.f32 %v1003_v14, %v890_v23 }
 0x260   :  { %1808 = vst.msk [vmem:[%s3528_s9 + $0x40] sm:$0xff] %vm687_vm1, %v1004_v25  ;;  %2010 = vmatmul.msk.f32.gmra.mxu2 %vm687_vm1, %v1004_v25 }
 0x262   :  { %2067 = vmatmul.msk.f32.gmra.mxu3 %vm109_vm0, %v2706_v29  ;;  %v902_v9 = vpop.f32.mrf.mxu2  ;;  %v3078_v18 = vpop.f32.mrf.mxu1 }
 0x265   :  { %v1006_v41 = vpop.f32.mrf.mxu3 }
 0x266   :  { %v1007_v42 = vadd.f32 %v1006_v41, %v893_v40 }
 0x268   :  { %1809 = vst.msk [vmem:[%s3528_s9 + $0x48] sm:$0xff] %vm687_vm1, %v1007_v42  ;;  %2011 = vmatmul.msk.f32.gmra.mxu2 %vm687_vm1, %v1007_v42 }
 0x26a   :  { %2068 = vmatmul.msk.f32.gmra.mxu3 %vm109_vm0, %v2716_v12  ;;  %v905_v19 = vpop.f32.mrf.mxu2 }
 0x26d   :  { %v1009_v49 = vpop.f32.mrf.mxu3 }
 0x26e   :  { %v1010_v51 = vadd.f32 %v1009_v49, %v896_v48 }
 0x270   :  { %1810 = vst.msk [vmem:[%s3528_s9 + $0x50] sm:$0xff] %vm687_vm1, %v1010_v51  ;;  %2012 = vmatmul.msk.f32.gmra.mxu2 %vm687_vm1, %v1010_v51 }
 0x272   :  { %2069 = vmatmul.msk.f32.gmra.mxu3 %vm109_vm0, %v2729_v5  ;;  %v3092_v5 = vpop.f32.mrf.mxu1 }
 0x275   :  { %v1012_v29 = vpop.f32.mrf.mxu3 }
 0x276   :  { %v1013_v45 = vadd.f32 %v1012_v29, %v899_v62 }
 0x278   :  { %1811 = vst.msk [vmem:[%s3528_s9 + $0x58] sm:$0xff] %vm687_vm1, %v1013_v45  ;;  %2013 = vmatmul.msk.f32.gmra.mxu2 %vm687_vm1, %v1013_v45 }
 0x27a   :  { %2070 = vmatmul.msk.f32.gmra.mxu3 %vm109_vm0, %v2749_v32  ;;  %v908_v32 = vpop.f32.mrf.mxu2  ;;  %v3103_v56 = vpop.f32.mrf.mxu1 }
 0x27d   :  { %v1015_v12 = vpop.f32.mrf.mxu3 }
 0x27e   :  { %v1016_v13 = vadd.f32 %v1015_v12, %v902_v9 }
 0x280   :  { %1812 = vst.msk [vmem:[%s3528_s9 + $0x60] sm:$0xff] %vm687_vm1, %v1016_v13  ;;  %2014 = vmatmul.msk.f32.gmra.mxu2 %vm687_vm1, %v1016_v13 }
 0x282   :  { %2071 = vmatmul.msk.f32.gmra.mxu3 %vm109_vm0, %v2771_v37  ;;  %v911_v37 = vpop.f32.mrf.mxu2  ;;  %v3112_v28 = vpop.f32.mrf.mxu1 }
 0x285   :  { %v1018_v22 = vpop.f32.mrf.mxu3 }
 0x286   :  { %v1019_v26 = vadd.f32 %v1018_v22, %v905_v19 }
 0x288   :  { %1813 = vst.msk [vmem:[%s3528_s9 + $0x68] sm:$0xff] %vm687_vm1, %v1019_v26  ;;  %2015 = vmatmul.msk.f32.gmra.mxu2 %vm687_vm1, %v1019_v26 }
 0x28a   :  { %2072 = vmatmul.msk.f32.gmra.mxu3 %vm109_vm0, %v2801_v59  ;;  %v3123_v58 = vpop.f32.mrf.mxu1 }
 0x28d   :  { %v1021_v38 = vpop.f32.mrf.mxu3 }
 0x28e   :  { %v1022_v16 = vadd.f32 %v1021_v38, %v908_v32 }
 0x290   :  { %1814 = vst.msk [vmem:[%s3528_s9 + $0x70] sm:$0xff] %vm687_vm1, %v1022_v16  ;;  %2016 = vmatmul.msk.f32.gmra.mxu2 %vm687_vm1, %v1022_v16 }
 0x292   :  { %2073 = vmatmul.msk.f32.gmra.mxu3 %vm109_vm0, %v2828_v8  ;;  %v3128_v8 = vld [vmem:[%s3529_s7] ss:$0 sm:$0xff] }
 0x295   :  { %v1024_v47 = vpop.f32.mrf.mxu3 }
 0x296   :  { %v1025_v31 = vadd.f32 %v1024_v47, %v911_v37 }
 0x298   :  { %1815 = vst.msk [vmem:[%s3528_s9 + $0x78] sm:$0xff] %vm687_vm1, %v1025_v31  ;;  %2017 = vmatmul.msk.f32.gmra.mxu2 %vm687_vm1, %v1025_v31 }
 0x29a   :  { %2074 = vmatmul.msk.f32.gmra.mxu3 %vm109_vm0, %v2739_v17  ;;  %v3135_v17 = vpop.f32.mrf.mxu1 }
 0x29d   :  { %v3121_v59 = vpop.f32.mrf.mxu3 }
 0x2a2   :  { %2075 = vmatmul.msk.f32.gmra.mxu3 %vm109_vm0, %v2760_v20  ;;  %v1656_v4 = vpop.f32.mrf.mxu1 }
 0x2a3   :  { %v1095_v53 = vpop.f32.mrf.mxu2 }
 0x2a4   :  { %v1096_v39 = vadd.f32 %v3128_v8, %v1095_v53 }
 0x2a5   :  { %v3133_v27 = vpop.f32.mrf.mxu3 }
 0x2a6   :  { %v2018_v43 = vmul.f32 -1.442695, %v1096_v39 }
 0x2a8   :  { %2149 = vpow2.f32 %v2018_v43 }
 0x2aa   :  { %2076 = vmatmul.msk.f32.gmra.mxu3 %vm109_vm0, %v2799_v50  ;;  %v1659_v62 = vpop.f32.mrf.mxu1 }
 0x2ab   :  { %v1098_v46 = vpop.f32.mrf.mxu2 }
 0x2ac   :  { %v1099_v57 = vadd.f32 %v3128_v8, %v1098_v46 }
 0x2ad   :  { %v3140_v34 = vpop.f32.mrf.mxu3 }
 0x2ae   :  { %v2150_v15 = vpop.eup %2149  ;;  %v2019_v61 = vmul.f32 -1.442695, %v1099_v57 }
 0x2af   :  { %v1191_v20 = vadd.f32 1.0, %v2150_v15 }
 0x2b0   :  { %2151 = vpow2.f32 %v2019_v61 }
 0x2b1   :  { %2153 = vrcp.f32 %v1191_v20  ;;  %v1218_v48 = vand.u32 2147483648, %v1191_v20  ;;  %v1216_v42 = vand.u32 2147483647, %v1191_v20  ;;  %vm1212_vm6 = vweird.f32 %v1191_v20 }
 0x2b2   :  { %2077 = vmatmul.msk.f32.gmra.mxu3 %vm109_vm0, %v2836_v60  ;;  %v1662_v57 = vpop.f32.mrf.mxu1 }
 0x2b3   :  { %v1101_v33 = vpop.f32.mrf.mxu2  ;;  %v1219_v13 = vor.u32 1.1754944e-38, %v1218_v48  ;;  %vm1217_vm8 = vcmp.eq.f32.partialorder %v1216_v42, 8.507059e+37 }
 0x2b4   :  { %v1102_v63 = vadd.f32 %v3128_v8, %v1101_v33 }
 0x2b5   :  { %v3145_v23 = vpop.f32.mrf.mxu3 }
 0x2b6   :  { %v2152_v50 = vpop.eup %2151  ;;  %v2020_v30 = vmul.f32 -1.442695, %v1102_v63 }
 0x2b7   :  { %v2154_v1 = vpop.eup %2153  ;;  %v1192_v10 = vadd.f32 1.0, %v2152_v50 }
 0x2b8   :  { %2155 = vpow2.f32 %v2020_v30  ;;  %v1208_v40 = vmul.f32 %v2154_v1, %v1191_v20  ;;  %vm1213_vm1 = vweird.f32 %v2154_v1 }
 0x2b9   :  { %2157 = vrcp.f32 %v1192_v10  ;;  %vm1214_vm7 = vmor %vm1212_vm6, %vm1213_vm1  ;;  %v1233_v37 = vand.u32 2147483648, %v1192_v10  ;;  %v1231_v53 = vand.u32 2147483647, %v1192_v10  ;;  %vm1227_vm10 = vweird.f32 %v1192_v10 }
 0x2ba   :  { %2078 = vmatmul.msk.f32.gmra.mxu3 %vm109_vm0, %v2863_v0  ;;  %v1209_v14 = vsub.f32 1.0, %v1208_v40 }
 0x2bb   :  { %v1104_v25 = vpop.f32.mrf.mxu2  ;;  %v1234_v61 = vor.u32 1.1754944e-38, %v1233_v37  ;;  %vm1232_vm12 = vcmp.eq.f32.partialorder %v1231_v53, 8.507059e+37 }
 0x2bc   :  { %v1105_v60 = vadd.f32 %v3128_v8, %v1104_v25  ;;  %v1210_v41 = vmul.f32 %v2154_v1, %v1209_v14 }
 0x2bd   :  { %v3150_v49 = vpop.f32.mrf.mxu3 }
 0x2be   :  { %v2156_v51 = vpop.eup %2155  ;;  %v2021_v29 = vmul.f32 -1.442695, %v1105_v60  ;;  %v1211_v9 = vadd.f32 %v2154_v1, %v1210_v41 }
 0x2bf   :  { %v2158_v45 = vpop.eup %2157  ;;  %v1193_v12 = vadd.f32 1.0, %v2156_v51 }
 0x2c0   :  { %2159 = vpow2.f32 %v2021_v29  ;;  %v1215_v0 = vsel %vm1214_vm7, %v2154_v1, %v1211_v9  ;;  %v1223_v19 = vmul.f32 %v2158_v45, %v1192_v10  ;;  %vm1228_vm9 = vweird.f32 %v2158_v45  ;;  %v1665_v9 = vpop.f32.mrf.mxu1 }
 0x2c1   :  { %2161 = vrcp.f32 %v1193_v12  ;;  %v3152_v22 = vsel %vm1217_vm8, %v1219_v13, %v1215_v0  ;;  %vm1229_vm11 = vmor %vm1227_vm10, %vm1228_vm9  ;;  %v1248_v10 = vand.u32 2147483648, %v1193_v12  ;;  %v1246_v25 = vand.u32 2147483647, %v1193_v12 }
 0x2c2   :  { %2079 = vmatmul.msk.f32.gmra.mxu3 %vm109_vm0, %v2887_v54  ;;  %v1752_v26 = vmul.f32 %v2979_v24, %v3152_v22  ;;  %v1768_v32 = vmul.f32 %v1656_v4, %v3152_v22  ;;  %v1224_v38 = vsub.f32 1.0, %v1223_v19  ;;  %vm1242_vm14 = vweird.f32 %v1193_v12 }
 0x2c3   :  { %v1107_v16 = vpop.f32.mrf.mxu2  ;;  %vm1247_vm2 = vcmp.eq.f32.partialorder %v1246_v25, 8.507059e+37 }
 0x2c4   :  { %v1108_v47 = vadd.f32 %v3128_v8, %v1107_v16  ;;  %1816 = vst.msk [vmem:[%s3530_s10] sm:$0xff] %vm109_vm0, %v1752_v26  ;;  %v1225_v31 = vmul.f32 %v2158_v45, %v1224_v38 }
 0x2c5   :  { %v3164_v39 = vpop.f32.mrf.mxu3  ;;  %2082 = vst.msk [vmem:[%s3530_s10 + $0x80] sm:$0xff] %vm109_vm0, %v1768_v32 }
 0x2c6   :  { %v2160_v54 = vpop.eup %2159  ;;  %v2022_v24 = vmul.f32 -1.442695, %v1108_v47  ;;  %v1226_v43 = vadd.f32 %v2158_v45, %v1225_v31 }
 0x2c7   :  { %v2162_v46 = vpop.eup %2161  ;;  %v1194_v15 = vadd.f32 1.0, %v2160_v54 }
 0x2c8   :  { %2163 = vpow2.f32 %v2022_v24  ;;  %v1230_v20 = vsel %vm1229_vm11, %v2158_v45, %v1226_v43  ;;  %v1238_v4 = vmul.f32 %v2162_v46, %v1193_v12  ;;  %vm1243_vm13 = vweird.f32 %v2162_v46 }
 0x2c9   :  { %2165 = vrcp.f32 %v1194_v15  ;;  %v3170_v33 = vsel %vm1232_vm12, %v1234_v61, %v1230_v20  ;;  %vm1244_vm15 = vmor %vm1242_vm14, %vm1243_vm13  ;;  %v1263_v26 = vand.u32 2147483648, %v1194_v15  ;;  %v1261_v16 = vand.u32 2147483647, %v1194_v15  ;;  %v1668_v20 = vpop.f32.mrf.mxu1 }
 0x2ca   :  { %2080 = vmatmul.msk.f32.gmra.mxu3 %vm109_vm0, %v2912_v7  ;;  %v1753_v63 = vmul.f32 %v2983_v44, %v3170_v33  ;;  %v1769_v50 = vmul.f32 %v1659_v62, %v3170_v33  ;;  %v1239_v30 = vsub.f32 1.0, %v1238_v4  ;;  %v1249_v62 = vor.u32 1.1754944e-38, %v1248_v10 }
 0x2cb   :  { %v1110_v1 = vpop.f32.mrf.mxu2  ;;  %vm1257_vm4 = vweird.f32 %v1194_v15  ;;  %v1264_v54 = vor.u32 1.1754944e-38, %v1263_v26  ;;  %vm1262_vm1 = vcmp.eq.f32.partialorder %v1261_v16, 8.507059e+37 }
 0x2cc   :  { %v1111_v40 = vadd.f32 %v3128_v8, %v1110_v1  ;;  %1817 = vst.msk [vmem:[%s3530_s10 + $0x8] sm:$0xff] %vm109_vm0, %v1753_v63  ;;  %v1240_v14 = vmul.f32 %v2162_v46, %v1239_v30 }
 0x2cd   :  { %v3182_v48 = vpop.f32.mrf.mxu3  ;;  %2083 = vst.msk [vmem:[%s3530_s10 + $0x88] sm:$0xff] %vm109_vm0, %v1769_v50 }
 0x2ce   :  { %v2164_v7 = vpop.eup %2163  ;;  %v2023_v44 = vmul.f32 -1.442695, %v1111_v40  ;;  %v1241_v60 = vadd.f32 %v2162_v46, %v1240_v14 }
 0x2cf   :  { %v2166_v41 = vpop.eup %2165  ;;  %v3188_v42 = vadd.f32 1.0, %v2164_v7 }
 0x2d0   :  { %2167 = vpow2.f32 %v2023_v44  ;;  %v1245_v51 = vsel %vm1244_vm15, %v2162_v46, %v1241_v60  ;;  %v1253_v29 = vmul.f32 %v2166_v41, %v1194_v15  ;;  %vm1258_vm3 = vweird.f32 %v2166_v41 }
 0x2d1   :  { %2169 = vrcp.f32 %v3188_v42  ;;  %v3191_v45 = vsel %vm1247_vm2, %v1249_v62, %v1245_v51  ;;  %vm1259_vm5 = vmor %vm1257_vm4, %vm1258_vm3  ;;  %v1278_v63 = vand.u32 2147483648, %v3188_v42  ;;  %v1276_v1 = vand.u32 2147483647, %v3188_v42  ;;  %v1671_v26 = vpop.f32.mrf.mxu1 }
 0x2d2   :  { %2081 = vmatmul.msk.f32.gmra.mxu3 %vm109_vm0, %v2938_v3  ;;  %v1754_v12 = vmul.f32 %v2992_v35, %v3191_v45  ;;  %v1770_v13 = vmul.f32 %v1662_v57, %v3191_v45  ;;  %v1254_v0 = vsub.f32 1.0, %v1253_v29  ;;  %vm1272_vm7 = vweird.f32 %v3188_v42 }
 0x2d3   :  { %v1113_v19 = vpop.f32.mrf.mxu2  ;;  %v1279_v60 = vor.u32 1.1754944e-38, %v1278_v63  ;;  %vm1277_vm9 = vcmp.eq.f32.partialorder %v1276_v1, 8.507059e+37 }
 0x2d4   :  { %v1114_v32 = vadd.f32 %v3128_v8, %v1113_v19  ;;  %1818 = vst.msk [vmem:[%s3530_s10 + $0x10] sm:$0xff] %vm109_vm0, %v1754_v12  ;;  %v1255_v38 = vmul.f32 %v2166_v41, %v1254_v0 }
 0x2d5   :  { %v3203_v37 = vpop.f32.mrf.mxu3  ;;  %2084 = vst.msk [vmem:[%s3530_s10 + $0x90] sm:$0xff] %vm109_vm0, %v1770_v13 }
 0x2d6   :  { %v2168_v3 = vpop.eup %2167  ;;  %v2024_v35 = vmul.f32 -1.442695, %v1114_v32  ;;  %v1256_v47 = vadd.f32 %v2166_v41, %v1255_v38 }
 0x2d7   :  { %v2170_v31 = vpop.eup %2169  ;;  %v3209_v53 = vadd.f32 1.0, %v2168_v3 }
 0x2d8   :  { %2171 = vpow2.f32 %v2024_v35  ;;  %v1260_v24 = vsel %vm1259_vm5, %v2166_v41, %v1256_v47  ;;  %v1268_v43 = vmul.f32 %v2170_v31, %v3188_v42  ;;  %vm1273_vm6 = vweird.f32 %v2170_v31 }
 0x2d9   :  { %2173 = vrcp.f32 %v3209_v53  ;;  %v3213_v46 = vsel %vm1262_vm1, %v1264_v54, %v1260_v24  ;;  %vm1274_vm8 = vmor %vm1272_vm7, %vm1273_vm6  ;;  %v1293_v12 = vand.u32 2147483648, %v3209_v53  ;;  %v1291_v19 = vand.u32 2147483647, %v3209_v53 }
 0x2da   :  { %v1755_v57 = vmul.f32 %v3006_v55, %v3213_v46  ;;  %v1771_v61 = vmul.f32 %v1665_v9, %v3213_v46  ;;  %v1269_v15 = vsub.f32 1.0, %v1268_v43  ;;  %vm1287_vm11 = vweird.f32 %v3209_v53 }
 0x2db   :  { %v1116_v4 = vpop.f32.mrf.mxu2  ;;  %vm1292_vm13 = vcmp.eq.f32.partialorder %v1291_v19, 8.507059e+37 }
 0x2dc   :  { %v1117_v50 = vadd.f32 %v3128_v8, %v1116_v4  ;;  %1819 = vst.msk [vmem:[%s3530_s10 + $0x18] sm:$0xff] %vm109_vm0, %v1755_v57  ;;  %v1270_v30 = vmul.f32 %v2170_v31, %v1269_v15 }
 0x2dd   :  { %v1704_v10 = vpop.f32.mrf.mxu3  ;;  %2085 = vst.msk [vmem:[%s3530_s10 + $0x98] sm:$0xff] %vm109_vm0, %v1771_v61 }
 0x2de   :  { %v2172_v55 = vpop.eup %2171  ;;  %v2025_v40 = vmul.f32 -1.442695, %v1117_v50  ;;  %v1784_v14 = vmul.f32 %v1704_v10, %v3152_v22  ;;  %v1271_v25 = vadd.f32 %v2170_v31, %v1270_v30 }
 0x2df   :  { %v2174_v7 = vpop.eup %2173  ;;  %v3231_v44 = vadd.f32 1.0, %v2172_v55 }
 0x2e0   :  { %2175 = vpow2.f32 %v2025_v40  ;;  %2098 = vst.msk [vmem:[%s3530_s10 + $0x100] sm:$0xff] %vm109_vm0, %v1784_v14  ;;  %v1275_v41 = vsel %vm1274_vm8, %v2170_v31, %v1271_v25  ;;  %v1283_v62 = vmul.f32 %v2174_v7, %v3209_v53  ;;  %vm1288_vm10 = vweird.f32 %v2174_v7  ;;  %v1674_v40 = vpop.f32.mrf.mxu1 }
 0x2e1   :  { %2177 = vrcp.f32 %v3231_v44  ;;  %v3239_v22 = vsel %vm1277_vm9, %v1279_v60, %v1275_v41  ;;  %vm1289_vm12 = vmor %vm1287_vm11, %vm1288_vm10  ;;  %v1294_v31 = vor.u32 1.1754944e-38, %v1293_v12  ;;  %v1308_v15 = vand.u32 2147483648, %v3231_v44 }
 0x2e2   :  { %v1756_v42 = vmul.f32 %v3017_v52, %v3239_v22  ;;  %v1772_v51 = vmul.f32 %v1668_v20, %v3239_v22  ;;  %v1284_v29 = vsub.f32 1.0, %v1283_v62  ;;  %v1306_v63 = vand.u32 2147483647, %v3231_v44 }
 0x2e3   :  { %v1119_v9 = vpop.f32.mrf.mxu2  ;;  %vm1302_vm15 = vweird.f32 %v3231_v44  ;;  %v1309_v25 = vor.u32 1.1754944e-38, %v1308_v15 }
 0x2e4   :  { %v1120_v13 = vadd.f32 %v3128_v8, %v1119_v9  ;;  %1820 = vst.msk [vmem:[%s3530_s10 + $0x20] sm:$0xff] %vm109_vm0, %v1756_v42  ;;  %v1285_v0 = vmul.f32 %v2174_v7, %v1284_v29  ;;  %vm1307_vm3 = vcmp.eq.f32.partialorder %v1306_v63, 8.507059e+37 }
 0x2e5   :  { %v1707_v32 = vpop.f32.mrf.mxu3  ;;  %2086 = vst.msk [vmem:[%s3530_s10 + $0xa0] sm:$0xff] %vm109_vm0, %v1772_v51 }
 0x2e6   :  { %v2176_v52 = vpop.eup %2175  ;;  %v2026_v38 = vmul.f32 -1.442695, %v1120_v13  ;;  %v1785_v16 = vmul.f32 %v1707_v32, %v3170_v33  ;;  %v1286_v3 = vadd.f32 %v2174_v7, %v1285_v0 }
 0x2e7   :  { %v2178_v35 = vpop.eup %2177  ;;  %v3257_v47 = vadd.f32 1.0, %v2176_v52 }
 0x2e8   :  { %2179 = vpow2.f32 %v2026_v38  ;;  %2099 = vst.msk [vmem:[%s3530_s10 + $0x108] sm:$0xff] %vm109_vm0, %v1785_v16  ;;  %v1290_v54 = vsel %vm1289_vm12, %v2174_v7, %v1286_v3  ;;  %v1298_v24 = vmul.f32 %v2178_v35, %v3231_v44  ;;  %vm1303_vm14 = vweird.f32 %v2178_v35 }
 0x2e9   :  { %2181 = vrcp.f32 %v3257_v47  ;;  %v3265_v33 = vsel %vm1292_vm13, %v1294_v31, %v1290_v54  ;;  %vm1304_vm2 = vmor %vm1302_vm15, %vm1303_vm14  ;;  %v1323_v51 = vand.u32 2147483648, %v3257_v47  ;;  %v1321_v12 = vand.u32 2147483647, %v3257_v47 }
 0x2ea   :  { %v1757_v53 = vmul.f32 %v3026_v11, %v3265_v33  ;;  %v1773_v43 = vmul.f32 %v1671_v26, %v3265_v33  ;;  %v1299_v57 = vsub.f32 1.0, %v1298_v24  ;;  %vm1317_vm5 = vweird.f32 %v3257_v47 }
 0x2eb   :  { %v1122_v61 = vpop.f32.mrf.mxu2  ;;  %v1324_v38 = vor.u32 1.1754944e-38, %v1323_v51  ;;  %vm1322_vm6 = vcmp.eq.f32.partialorder %v1321_v12, 8.507059e+37 }
 0x2ec   :  { %v1123_v20 = vadd.f32 %v3128_v8, %v1122_v61  ;;  %1821 = vst.msk [vmem:[%s3530_s10 + $0x28] sm:$0xff] %vm109_vm0, %v1757_v53  ;;  %v1300_v4 = vmul.f32 %v2178_v35, %v1299_v57 }
 0x2ed   :  { %v1710_v50 = vpop.f32.mrf.mxu3  ;;  %2087 = vst.msk [vmem:[%s3530_s10 + $0xa8] sm:$0xff] %vm109_vm0, %v1773_v43 }
 0x2ee   :  { %v2180_v11 = vpop.eup %2179  ;;  %v2027_v30 = vmul.f32 -1.442695, %v1123_v20  ;;  %v1786_v1 = vmul.f32 %v1710_v50, %v3191_v45  ;;  %v1301_v10 = vadd.f32 %v2178_v35, %v1300_v4 }
 0x2ef   :  { %v2182_v55 = vpop.eup %2181  ;;  %v3283_v14 = vadd.f32 1.0, %v2180_v11 }
 0x2f0   :  { %2183 = vpow2.f32 %v2027_v30  ;;  %2100 = vst.msk [vmem:[%s3530_s10 + $0x110] sm:$0xff] %vm109_vm0, %v1786_v1  ;;  %v1305_v7 = vsel %vm1304_vm2, %v2178_v35, %v1301_v10  ;;  %v1313_v60 = vmul.f32 %v2182_v55, %v3257_v47  ;;  %vm1318_vm4 = vweird.f32 %v2182_v55  ;;  %v1677_v35 = vpop.f32.mrf.mxu1 }
 0x2f1   :  { %2185 = vrcp.f32 %v3283_v14  ;;  %v3291_v45 = vsel %vm1307_vm3, %v1309_v25, %v1305_v7  ;;  %vm1319_vm1 = vmor %vm1317_vm5, %vm1318_vm4  ;;  %v1338_v53 = vand.u32 2147483648, %v3283_v14  ;;  %v1336_v61 = vand.u32 2147483647, %v3283_v14 }
 0x2f2   :  { %v1758_v44 = vmul.f32 %v3035_v6, %v3291_v45  ;;  %v1774_v41 = vmul.f32 %v1674_v40, %v3291_v45  ;;  %v1314_v62 = vsub.f32 1.0, %v1313_v60  ;;  %vm1332_vm8 = vweird.f32 %v3283_v14 }
 0x2f3   :  { %v1125_v42 = vpop.f32.mrf.mxu2  ;;  %v1339_v30 = vor.u32 1.1754944e-38, %v1338_v53  ;;  %vm1337_vm10 = vcmp.eq.f32.partialorder %v1336_v61, 8.507059e+37 }
 0x2f4   :  { %v1126_v29 = vadd.f32 %v3128_v8, %v1125_v42  ;;  %1822 = vst.msk [vmem:[%s3530_s10 + $0x30] sm:$0xff] %vm109_vm0, %v1758_v44  ;;  %v1315_v9 = vmul.f32 %v2182_v55, %v1314_v62 }
 0x2f5   :  { %v1713_v13 = vpop.f32.mrf.mxu3  ;;  %2088 = vst.msk [vmem:[%s3530_s10 + $0xb0] sm:$0xff] %vm109_vm0, %v1774_v41 }
 0x2f6   :  { %v2184_v6 = vpop.eup %2183  ;;  %v2028_v0 = vmul.f32 -1.442695, %v1126_v29  ;;  %v1787_v19 = vmul.f32 %v1713_v13, %v3213_v46  ;;  %v1316_v26 = vadd.f32 %v2182_v55, %v1315_v9 }
 0x2f7   :  { %v2186_v32 = vpop.eup %2185  ;;  %v3309_v52 = vadd.f32 1.0, %v2184_v6 }
 0x2f8   :  { %2187 = vpow2.f32 %v2028_v0  ;;  %2101 = vst.msk [vmem:[%s3530_s10 + $0x118] sm:$0xff] %vm109_vm0, %v1787_v19  ;;  %v1320_v16 = vsel %vm1319_vm1, %v2182_v55, %v1316_v26  ;;  %v1328_v3 = vmul.f32 %v2186_v32, %v3283_v14  ;;  %vm1333_vm7 = vweird.f32 %v2186_v32 }
 0x2f9   :  { %2189 = vrcp.f32 %v3309_v52  ;;  %v3317_v46 = vsel %vm1322_vm6, %v1324_v38, %v1320_v16  ;;  %vm1334_vm9 = vmor %vm1332_vm8, %vm1333_vm7  ;;  %v1353_v7 = vand.u32 2147483648, %v3309_v52  ;;  %v1351_v41 = vand.u32 2147483647, %v3309_v52 }
 0x2fa   :  { %v1759_v47 = vmul.f32 %v3049_v2, %v3317_v46  ;;  %v1775_v31 = vmul.f32 %v1677_v35, %v3317_v46  ;;  %v1329_v54 = vsub.f32 1.0, %v1328_v3  ;;  %vm1347_vm12 = vweird.f32 %v3309_v52 }
 0x2fb   :  { %v1128_v24 = vpop.f32.mrf.mxu2  ;;  %v1354_v12 = vor.u32 1.1754944e-38, %v1353_v7  ;;  %vm1352_vm14 = vcmp.eq.f32.partialorder %v1351_v41, 8.507059e+37 }
 0x2fc   :  { %v1129_v43 = vadd.f32 %v3128_v8, %v1128_v24  ;;  %1823 = vst.msk [vmem:[%s3530_s10 + $0x38] sm:$0xff] %vm109_vm0, %v1759_v47  ;;  %v1330_v57 = vmul.f32 %v2186_v32, %v1329_v54 }
 0x2fd   :  { %v1716_v15 = vpop.f32.mrf.mxu3  ;;  %2089 = vst.msk [vmem:[%s3530_s10 + $0xb8] sm:$0xff] %vm109_vm0, %v1775_v31 }
 0x2fe   :  { %v2188_v2 = vpop.eup %2187  ;;  %v2029_v20 = vmul.f32 -1.442695, %v1129_v43  ;;  %v1788_v4 = vmul.f32 %v1716_v15, %v3239_v22  ;;  %v1331_v63 = vadd.f32 %v2186_v32, %v1330_v57 }
 0x2ff   :  { %v2190_v50 = vpop.eup %2189  ;;  %v3335_v11 = vadd.f32 1.0, %v2188_v2 }
 0x300   :  { %2191 = vpow2.f32 %v2029_v20  ;;  %2102 = vst.msk [vmem:[%s3530_s10 + $0x120] sm:$0xff] %vm109_vm0, %v1788_v4  ;;  %v1335_v1 = vsel %vm1334_vm9, %v2186_v32, %v1331_v63  ;;  %v1343_v10 = vmul.f32 %v2190_v50, %v3309_v52  ;;  %vm1348_vm11 = vweird.f32 %v2190_v50 }
 0x301   :  { %2193 = vrcp.f32 %v3335_v11  ;;  %v3343_v22 = vsel %vm1337_vm10, %v1339_v30, %v1335_v1  ;;  %vm1349_vm13 = vmor %vm1347_vm12, %vm1348_vm11  ;;  %v1368_v52 = vand.u32 2147483648, %v3335_v11  ;;  %v1366_v3 = vand.u32 2147483647, %v3335_v11 }
 0x302   :  { %v1760_v55 = vmul.f32 %v3060_v36, %v3343_v22  ;;  %v1776_v40 = vmul.f32 %v3121_v59, %v3343_v22  ;;  %v1344_v14 = vsub.f32 1.0, %v1343_v10  ;;  %vm1362_vm2 = vweird.f32 %v3335_v11 }
 0x303   :  { %v1131_v25 = vpop.f32.mrf.mxu2  ;;  %v1369_v53 = vor.u32 1.1754944e-38, %v1368_v52  ;;  %vm1367_vm4 = vcmp.eq.f32.partialorder %v1366_v3, 8.507059e+37 }
 0x304   :  { %v1132_v60 = vadd.f32 %v3128_v8, %v1131_v25  ;;  %1824 = vst.msk [vmem:[%s3530_s10 + $0x40] sm:$0xff] %vm109_vm0, %v1760_v55  ;;  %v1345_v44 = vmul.f32 %v2190_v50, %v1344_v14 }
 0x305   :  { %v1719_v62 = vpop.f32.mrf.mxu3  ;;  %2090 = vst.msk [vmem:[%s3530_s10 + $0xc0] sm:$0xff] %vm109_vm0, %v1776_v40 }
 0x306   :  { %v2192_v36 = vpop.eup %2191  ;;  %v2030_v59 = vmul.f32 -1.442695, %v1132_v60  ;;  %v1789_v42 = vmul.f32 %v1719_v62, %v3265_v33  ;;  %v1346_v51 = vadd.f32 %v2190_v50, %v1345_v44 }
 0x307   :  { %v2194_v29 = vpop.eup %2193  ;;  %v3362_v9 = vadd.f32 1.0, %v2192_v36 }
 0x308   :  { %2195 = vpow2.f32 %v2030_v59  ;;  %2103 = vst.msk [vmem:[%s3530_s10 + $0x128] sm:$0xff] %vm109_vm0, %v1789_v42  ;;  %v1350_v13 = vsel %vm1349_vm13, %v2190_v50, %v1346_v51  ;;  %v1358_v6 = vmul.f32 %v2194_v29, %v3335_v11  ;;  %vm1363_vm15 = vweird.f32 %v2194_v29 }
 0x309   :  { %2197 = vrcp.f32 %v3362_v9  ;;  %v3370_v33 = vsel %vm1352_vm14, %v1354_v12, %v1350_v13  ;;  %vm1364_vm3 = vmor %vm1362_vm2, %vm1363_vm15  ;;  %v1383_v4 = vand.u32 2147483648, %v3362_v9  ;;  %v1381_v11 = vand.u32 2147483647, %v3362_v9 }
 0x30a   :  { %v1761_v0 = vmul.f32 %v3069_v21, %v3370_v33  ;;  %v1777_v19 = vmul.f32 %v3133_v27, %v3370_v33  ;;  %v1359_v26 = vsub.f32 1.0, %v1358_v6  ;;  %vm1377_vm1 = vweird.f32 %v3362_v9 }
 0x30b   :  { %v1134_v32 = vpop.f32.mrf.mxu2  ;;  %v1384_v14 = vor.u32 1.1754944e-38, %v1383_v4  ;;  %vm1382_vm7 = vcmp.eq.f32.partialorder %v1381_v11, 8.507059e+37 }
 0x30c   :  { %v1135_v38 = vadd.f32 %v3128_v8, %v1134_v32  ;;  %1825 = vst.msk [vmem:[%s3530_s10 + $0x48] sm:$0xff] %vm109_vm0, %v1761_v0  ;;  %v1360_v16 = vmul.f32 %v2194_v29, %v1359_v26 }
 0x30d   :  { %v1722_v35 = vpop.f32.mrf.mxu3  ;;  %2091 = vst.msk [vmem:[%s3530_s10 + $0xc8] sm:$0xff] %vm109_vm0, %v1777_v19 }
 0x30e   :  { %v2196_v21 = vpop.eup %2195  ;;  %v2031_v27 = vmul.f32 -1.442695, %v1135_v38  ;;  %v1790_v47 = vmul.f32 %v1722_v35, %v3291_v45  ;;  %v1361_v31 = vadd.f32 %v2194_v29, %v1360_v16 }
 0x30f   :  { %v2198_v54 = vpop.eup %2197  ;;  %v3389_v24 = vadd.f32 1.0, %v2196_v21 }
 0x310   :  { %2199 = vpow2.f32 %v2031_v27  ;;  %2104 = vst.msk [vmem:[%s3530_s10 + $0x130] sm:$0xff] %vm109_vm0, %v1790_v47  ;;  %v1365_v43 = vsel %vm1364_vm3, %v2194_v29, %v1361_v31  ;;  %v1373_v57 = vmul.f32 %v2198_v54, %v3362_v9  ;;  %vm1378_vm5 = vweird.f32 %v2198_v54 }
 0x311   :  { %2201 = vrcp.f32 %v3389_v24  ;;  %v3397_v45 = vsel %vm1367_vm4, %v1369_v53, %v1365_v43  ;;  %vm1379_vm6 = vmor %vm1377_vm1, %vm1378_vm5  ;;  %v1398_v36 = vand.u32 2147483648, %v3389_v24  ;;  %v1396_v51 = vand.u32 2147483647, %v3389_v24 }
 0x312   :  { %v1762_v61 = vmul.f32 %v3078_v18, %v3397_v45  ;;  %v1778_v15 = vmul.f32 %v3140_v34, %v3397_v45  ;;  %v1374_v2 = vsub.f32 1.0, %v1373_v57  ;;  %vm1392_vm9 = vweird.f32 %v3389_v24 }
 0x313   :  { %v1137_v20 = vpop.f32.mrf.mxu2  ;;  %v1399_v6 = vor.u32 1.1754944e-38, %v1398_v36  ;;  %vm1397_vm11 = vcmp.eq.f32.partialorder %v1396_v51, 8.507059e+37 }
 0x314   :  { %v1138_v63 = vadd.f32 %v3128_v8, %v1137_v20  ;;  %1826 = vst.msk [vmem:[%s3530_s10 + $0x50] sm:$0xff] %vm109_vm0, %v1762_v61  ;;  %v1375_v50 = vmul.f32 %v2198_v54, %v1374_v2 }
 0x315   :  { %v1725_v30 = vpop.f32.mrf.mxu3  ;;  %2092 = vst.msk [vmem:[%s3530_s10 + $0xd0] sm:$0xff] %vm109_vm0, %v1778_v15 }
 0x316   :  { %v2200_v18 = vpop.eup %2199  ;;  %v2032_v34 = vmul.f32 -1.442695, %v1138_v63  ;;  %v1791_v1 = vmul.f32 %v1725_v30, %v3317_v46  ;;  %v1376_v10 = vadd.f32 %v2198_v54, %v1375_v50 }
 0x317   :  { %v2202_v55 = vpop.eup %2201  ;;  %v1204_v40 = vadd.f32 1.0, %v2200_v18 }
 0x318   :  { %2203 = vpow2.f32 %v2032_v34  ;;  %2105 = vst.msk [vmem:[%s3530_s10 + $0x138] sm:$0xff] %vm109_vm0, %v1791_v1  ;;  %v1380_v25 = vsel %vm1379_vm6, %v2198_v54, %v1376_v10  ;;  %v1388_v7 = vmul.f32 %v2202_v55, %v3389_v24  ;;  %vm1393_vm8 = vweird.f32 %v2202_v55 }
 0x319   :  { %2205 = vrcp.f32 %v1204_v40  ;;  %v3421_v60 = vsel %vm1382_vm7, %v1384_v14, %v1380_v25  ;;  %vm1394_vm10 = vmor %vm1392_vm9, %vm1393_vm8  ;;  %v1413_v38 = vand.u32 2147483648, %v1204_v40  ;;  %v1411_v3 = vand.u32 2147483647, %v1204_v40 }
 0x31a   :  { %v1763_v46 = vmul.f32 %v3092_v5, %v3421_v60  ;;  %v1779_v44 = vmul.f32 %v3145_v23, %v3421_v60  ;;  %v1389_v41 = vsub.f32 1.0, %v1388_v7  ;;  %vm1407_vm13 = vweird.f32 %v1204_v40 }
 0x31b   :  { %v1140_v62 = vpop.f32.mrf.mxu2  ;;  %v1414_v31 = vor.u32 1.1754944e-38, %v1413_v38  ;;  %vm1412_vm15 = vcmp.eq.f32.partialorder %v1411_v3, 8.507059e+37 }
 0x31c   :  { %v1141_v59 = vadd.f32 %v3128_v8, %v1140_v62  ;;  %1827 = vst.msk [vmem:[%s3530_s10 + $0x58] sm:$0xff] %vm109_vm0, %v1763_v46  ;;  %v1390_v42 = vmul.f32 %v2202_v55, %v1389_v41 }
 0x31d   :  { %v1728_v29 = vpop.f32.mrf.mxu3  ;;  %2093 = vst.msk [vmem:[%s3530_s10 + $0xd8] sm:$0xff] %vm109_vm0, %v1779_v44 }
 0x31e   :  { %v2204_v5 = vpop.eup %2203  ;;  %v2033_v23 = vmul.f32 -1.442695, %v1141_v59  ;;  %v1792_v9 = vmul.f32 %v1728_v29, %v3343_v22  ;;  %v1391_v8 = vadd.f32 %v2202_v55, %v1390_v42 }
 0x31f   :  { %v2206_v12 = vpop.eup %2205  ;;  %v1205_v13 = vadd.f32 1.0, %v2204_v5 }
 0x320   :  { %2207 = vpow2.f32 %v2033_v23  ;;  %2106 = vst.msk [vmem:[%s3530_s10 + $0x140] sm:$0xff] %vm109_vm0, %v1792_v9  ;;  %v1395_v0 = vsel %vm1394_vm10, %v2202_v55, %v1391_v8  ;;  %v1403_v19 = vmul.f32 %v2206_v12, %v1204_v40  ;;  %vm1408_vm12 = vweird.f32 %v2206_v12 }
 0x321   :  { %2209 = vrcp.f32 %v1205_v13  ;;  %v3444_v26 = vsel %vm1397_vm11, %v1399_v6, %v1395_v0  ;;  %vm1409_vm14 = vmor %vm1407_vm13, %vm1408_vm12  ;;  %v1428_v61 = vand.u32 2147483648, %v1205_v13  ;;  %v1426_v2 = vand.u32 2147483647, %v1205_v13 }
 0x322   :  { %v1764_v22 = vmul.f32 %v3103_v56, %v3444_v26  ;;  %v1780_v32 = vmul.f32 %v3150_v49, %v3444_v26  ;;  %v1404_v52 = vsub.f32 1.0, %v1403_v19  ;;  %vm1422_vm3 = vweird.f32 %v1205_v13 }
 0x323   :  { %v1429_v63 = vor.u32 1.1754944e-38, %v1428_v61  ;;  %vm1427_vm5 = vcmp.eq.f32.partialorder %v1426_v2, 8.507059e+37 }
 0x324   :  { %1828 = vst.msk [vmem:[%s3530_s10 + $0x60] sm:$0xff] %vm109_vm0, %v1764_v22  ;;  %v1405_v16 = vmul.f32 %v2206_v12, %v1404_v52 }
 0x325   :  { %v1731_v35 = vpop.f32.mrf.mxu3  ;;  %2094 = vst.msk [vmem:[%s3530_s10 + $0xe0] sm:$0xff] %vm109_vm0, %v1780_v32 }
 0x326   :  { %v2208_v56 = vpop.eup %2207  ;;  %v1793_v21 = vmul.f32 %v1731_v35, %v3370_v33  ;;  %v1406_v49 = vadd.f32 %v2206_v12, %v1405_v16 }
 0x327   :  { %v2210_v27 = vpop.eup %2209  ;;  %v1206_v47 = vadd.f32 1.0, %v2208_v56 }
 0x328   :  { %2107 = vst.msk [vmem:[%s3530_s10 + $0x148] sm:$0xff] %vm109_vm0, %v1793_v21  ;;  %v1410_v54 = vsel %vm1409_vm14, %v2206_v12, %v1406_v49  ;;  %v1418_v24 = vmul.f32 %v2210_v27, %v1205_v13  ;;  %vm1423_vm2 = vweird.f32 %v2210_v27 }
 0x329   :  { %2211 = vrcp.f32 %v1206_v47  ;;  %v1415_v53 = vsel %vm1412_vm15, %v1414_v31, %v1410_v54  ;;  %vm1424_vm4 = vmor %vm1422_vm3, %vm1423_vm2  ;;  %v1441_v55 = vand.u32 2147483647, %v1206_v47  ;;  %vm1437_vm6 = vweird.f32 %v1206_v47 }
 0x32a   :  { %v1765_v43 = vmul.f32 %v3112_v28, %v1415_v53  ;;  %v1781_v33 = vmul.f32 %v3164_v39, %v1415_v53  ;;  %v1419_v57 = vsub.f32 1.0, %v1418_v24 }
 0x32b   :  { %vm1442_vm8 = vcmp.eq.f32.partialorder %v1441_v55, 8.507059e+37 }
 0x32c   :  { %1829 = vst.msk [vmem:[%s3530_s10 + $0x68] sm:$0xff] %vm109_vm0, %v1765_v43  ;;  %v1420_v15 = vmul.f32 %v2210_v27, %v1419_v57 }
 0x32d   :  { %v1734_v20 = vpop.f32.mrf.mxu3  ;;  %2095 = vst.msk [vmem:[%s3530_s10 + $0xe8] sm:$0xff] %vm109_vm0, %v1781_v33 }
 0x32e   :  { %v1794_v28 = vmul.f32 %v1734_v20, %v3397_v45  ;;  %v1421_v4 = vadd.f32 %v2210_v27, %v1420_v15  ;;  %v1443_v45 = vand.u32 2147483648, %v1206_v47 }
 0x32f   :  { %v2212_v39 = vpop.eup %2211 }
 0x330   :  { %2108 = vst.msk [vmem:[%s3530_s10 + $0x150] sm:$0xff] %vm109_vm0, %v1794_v28  ;;  %v1425_v50 = vsel %vm1424_vm4, %v2210_v27, %v1421_v4  ;;  %v1433_v11 = vmul.f32 %v2212_v39, %v1206_v47  ;;  %vm1438_vm1 = vweird.f32 %v2212_v39 }
 0x331   :  { %v1430_v30 = vsel %vm1427_vm5, %v1429_v63, %v1425_v50  ;;  %vm1439_vm7 = vmor %vm1437_vm6, %vm1438_vm1 }
 0x332   :  { %v1766_v18 = vmul.f32 %v3123_v58, %v1430_v30  ;;  %v1782_v34 = vmul.f32 %v3182_v48, %v1430_v30  ;;  %v1434_v1 = vsub.f32 1.0, %v1433_v11  ;;  %v1444_v48 = vor.u32 1.1754944e-38, %v1443_v45 }
 0x334   :  { %1830 = vst.msk [vmem:[%s3530_s10 + $0x70] sm:$0xff] %vm109_vm0, %v1766_v18  ;;  %v1435_v10 = vmul.f32 %v2212_v39, %v1434_v1 }
 0x335   :  { %v1737_v40 = vpop.f32.mrf.mxu3  ;;  %2096 = vst.msk [vmem:[%s3530_s10 + $0xf0] sm:$0xff] %vm109_vm0, %v1782_v34 }
 0x336   :  { %v1795_v58 = vmul.f32 %v1737_v40, %v3421_v60  ;;  %v1436_v14 = vadd.f32 %v2212_v39, %v1435_v10 }
 0x338   :  { %2109 = vst.msk [vmem:[%s3530_s10 + $0x158] sm:$0xff] %vm109_vm0, %v1795_v58  ;;  %v1440_v25 = vsel %vm1439_vm7, %v2212_v39, %v1436_v14 }
 0x339   :  { %v1445_v7 = vsel %vm1442_vm8, %v1444_v48, %v1440_v25 }
 0x33a   :  { %v1767_v46 = vmul.f32 %v3135_v17, %v1445_v7  ;;  %v1783_v44 = vmul.f32 %v3203_v37, %v1445_v7 }
 0x33c   :  { %1831 = vst.msk [vmem:[%s3530_s10 + $0x78] sm:$0xff] %vm109_vm0, %v1767_v46 }
 0x33d   :  { %v1740_v60 = vpop.f32.mrf.mxu3  ;;  %2097 = vst.msk [vmem:[%s3530_s10 + $0xf8] sm:$0xff] %vm109_vm0, %v1783_v44 }
 0x33e   :  { %v1796_v41 = vmul.f32 %v1740_v60, %v3444_v26 }
 0x340   :  { %2110 = vst.msk [vmem:[%s3530_s10 + $0x160] sm:$0xff] %vm109_vm0, %v1796_v41 }
 0x345   :  { %v1743_v17 = vpop.f32.mrf.mxu3 }
 0x346   :  { %v1797_v37 = vmul.f32 %v1743_v17, %v1415_v53 }
 0x348   :  { %2111 = vst.msk [vmem:[%s3530_s10 + $0x168] sm:$0xff] %vm109_vm0, %v1797_v37 }
 0x34d   :  { %v1746_v62 = vpop.f32.mrf.mxu3 }
 0x34e   :  { %v1798_v36 = vmul.f32 %v1746_v62, %v1430_v30 }
 0x350   :  { %2112 = vst.msk [vmem:[%s3530_s10 + $0x170] sm:$0xff] %vm109_vm0, %v1798_v36 }
 0x355   :  { %v1749_v59 = vpop.f32.mrf.mxu3 }
 0x356   :  { %v1799_v42 = vmul.f32 %v1749_v59, %v1445_v7 }
 0x358   :  { %2113 = vst.msk [vmem:[%s3530_s10 + $0x178] sm:$0xff] %vm109_vm0, %v1799_v42 }

</bundles_post_ra>
